<compile_context>
chip_gen: v5e
topology: v5e:2x2
jax: 0.10.0
libtpu: 0.0.40
codegen_flags: <defaults>
</compile_context>

<pallas_src>
import functools

import jax
import jax.numpy as jnp
from jax.experimental import pallas as pl
from jax.experimental.pallas import tpu as pltpu


def _round_up(n, m):
    return (n + m - 1) // m * m


# --------------------------------------------------------------------------- kernel

def ae_kernel(x_ref,
              w1, b1, w2, b2, w3, b3,          # encoder weights (bf16) / biases (f32)
              w4, b4, w5, b5, w6, b6,          # decoder weights (bf16) / biases (f32)
              z_ref, recon_ref):
    bf16 = jnp.bfloat16
    f32 = jnp.float32

    x = x_ref[...].astype(bf16)                                      # (tb, x_dim)

    # ---- encoder ----
    h = jnp.maximum(jnp.dot(x, w1[...], preferred_element_type=f32) + b1[...], 0.0)
    h = jnp.maximum(jnp.dot(h.astype(bf16), w2[...], preferred_element_type=f32) + b2[...], 0.0)
    z = jnp.dot(h.astype(bf16), w3[...], preferred_element_type=f32) + b3[...]
    z_ref[...] = z.astype(z_ref.dtype)                               # padded cols are exactly 0

    # ---- decoder ----
    h = jnp.maximum(jnp.dot(z.astype(bf16), w4[...], preferred_element_type=f32) + b4[...], 0.0)
    h = jnp.maximum(jnp.dot(h.astype(bf16), w5[...], preferred_element_type=f32) + b5[...], 0.0)
    r = jnp.dot(h.astype(bf16), w6[...], preferred_element_type=f32) + b6[...]
    recon_ref[...] = r.astype(recon_ref.dtype)


# --------------------------------------------------------------------------- params

def prepare_params(params, x_dim, z_dim):
    """One-time prep: cast weights to bf16, zero-pad only the narrow OUTPUT dims (and the
    matching decoder input dim) up to 128 so stores are lane-dense.  Biases stay f32."""
    xp, zp = _round_up(x_dim, 128), _round_up(z_dim, 128)
    io_dims = [(x_dim, 512), (512, 256), (256, zp),      # encoder (z cols padded)
               (zp, 256), (256, 512), (512, xp)]         # decoder (z rows / recon cols padded)
    flat = []
    for (w, b), (fin_p, fout_p) in zip(params, io_dims):
        fin, fout = w.shape
        wp = jnp.zeros((fin_p, fout_p), jnp.bfloat16).at[:fin, :fout].set(w.astype(jnp.bfloat16))
        bp = jnp.zeros((1, fout_p), jnp.float32).at[:, :fout].set(b.astype(jnp.float32))
        flat += [wp, bp]
    return flat, xp, zp


def _pick_tile(batch):
    """Batch tile: whole batch in one step when small (weight-DMA bound); otherwise the
    biggest tile in {512,256,128} with <=12.5% padding waste and a grid of >=2 steps
    (keeps both v7x TensorCores busy; neutral on v5e/v6e)."""
    b8 = _round_up(batch, 8)
    if b8 <= 128:
        return b8
    for tb in (512, 256, 128):
        b_pad = _round_up(b8, tb)
        if b_pad // tb >= 2 and (b_pad - batch) * 8 <= b_pad:
            return tb
    return 128


# --------------------------------------------------------------------------- forward

def _ae_forward_impl(x, *flat, x_dim, z_dim, xp, zp):
    B = x.shape[0]
    tb = _pick_tile(B)
    b_pad = _round_up(B, tb)
    if b_pad != B:
        x = jnp.pad(x, ((0, b_pad - B), (0, 0)))         # batch pad only (feature dim untouched)

    def full_spec(shape):
        return pl.BlockSpec(shape, lambda i: (0, 0))     # replicated: constant block index

    in_specs = [pl.BlockSpec((tb, x_dim), lambda i: (i, 0))]
    in_specs += [full_spec(a.shape) for a in flat]

    out_specs = (pl.BlockSpec((tb, zp), lambda i: (i, 0)),
                 pl.BlockSpec((tb, xp), lambda i: (i, 0)))
    out_shape = (jax.ShapeDtypeStruct((b_pad, zp), jnp.float32),
                 jax.ShapeDtypeStruct((b_pad, xp), jnp.float32))

    z_p, recon_p = pl.pallas_call(
        ae_kernel,
        grid=(b_pad // tb,),
        in_specs=in_specs,
        out_specs=out_specs,
        out_shape=out_shape,
        compiler_params=pltpu.CompilerParams(
            dimension_semantics=("parallel",)),
    )(x, *flat)

    return {"z": [z_p[:B, :z_dim]], "recon": recon_p[:B, :x_dim]}


def make_ae_forward(params, x_dim, z_dim):
    """Pads/casts params once, returns a jitted forward `fn(x) -> {'z': [z], 'recon': recon}`."""
    flat, xp, zp = prepare_params(params, x_dim, z_dim)
    impl = functools.partial(_ae_forward_impl, x_dim=x_dim, z_dim=z_dim, xp=xp, zp=zp)
    jitted = jax.jit(impl)

    def forward(x):
        return jitted(x, *flat)

    return forward


# --------------------------------------------------------------------------- reference / init

def init_params(key, x_dim, z_dim):
    """Deterministic synthetic init matching the AE layer shapes (f32, (in,out) layout)."""
    dims = [(x_dim, 512), (512, 256), (256, z_dim),      # encoder
            (z_dim, 256), (256, 512), (512, x_dim)]      # decoder
    params = []
    for (fin, fout) in dims:
        key, kw, kb = jax.random.split(key, 3)
        scale = 1.0 / jnp.sqrt(jnp.float32(fin))
        w = jax.random.uniform(kw, (fin, fout), jnp.float32, -scale, scale)
        b = jax.random.uniform(kb, (1, fout), jnp.float32, -scale, scale)
        params.append((w, b))
    return params


def ae_reference(x, params):
    """Plain-JAX reference mirroring the kernel math (bf16 operands, f32 accumulation)."""
    def lin(h, w, b, relu):
        y = jnp.dot(h.astype(jnp.bfloat16), w.astype(jnp.bfloat16),
                    preferred_element_type=jnp.float32) + b.astype(jnp.float32)
        return jnp.maximum(y, 0.0) if relu else y

    h = x
    for i, (w, b) in enumerate(params[:3]):
        h = lin(h, w, b, i < 2)
    z = h
    for i, (w, b) in enumerate(params[3:]):
        h = lin(h, w, b, i < 2)
    return z, h


# --------------------------------------------------------------------------- demo

if __name__ == "__main__":
    x_dim, z_dim, batch = 64, 32, 16

    key = jax.random.PRNGKey(0)
    key, kx = jax.random.split(key)
    x = jax.random.normal(kx, (batch, x_dim), jnp.float32)
    params = init_params(key, x_dim, z_dim)

    forward = make_ae_forward(params, x_dim, z_dim)      # params padded/cast exactly once
    out = forward(x)
    z = jax.block_until_ready(out["z"][0])
    recon = jax.block_until_ready(out["recon"])

    z_ref, recon_ref = ae_reference(x, params)
    assert z.shape == (batch, z_dim) and recon.shape == (batch, x_dim)
    assert jnp.allclose(z, z_ref, atol=1e-2, rtol=1e-2)
    assert jnp.allclose(recon, recon_ref, atol=1e-2, rtol=1e-2)

    print("KERNEL_OK")
</pallas_src>

<mosaic_0001>
module attributes {stable_mosaic.version = 11 : i64} {
  func.func @ae_kernel(%arg0: i32, %arg1: memref<16x64xf32, #tpu.memory_space<vmem>>, %arg2: memref<64x512xbf16, #tpu.memory_space<vmem>>, %arg3: memref<1x512xf32, #tpu.memory_space<vmem>>, %arg4: memref<512x256xbf16, #tpu.memory_space<vmem>>, %arg5: memref<1x256xf32, #tpu.memory_space<vmem>>, %arg6: memref<256x128xbf16, #tpu.memory_space<vmem>>, %arg7: memref<1x128xf32, #tpu.memory_space<vmem>>, %arg8: memref<128x256xbf16, #tpu.memory_space<vmem>>, %arg9: memref<1x256xf32, #tpu.memory_space<vmem>>, %arg10: memref<256x512xbf16, #tpu.memory_space<vmem>>, %arg11: memref<1x512xf32, #tpu.memory_space<vmem>>, %arg12: memref<512x128xbf16, #tpu.memory_space<vmem>>, %arg13: memref<1x128xf32, #tpu.memory_space<vmem>>, %arg14: memref<16x128xf32, #tpu.memory_space<vmem>>, %arg15: memref<16x128xf32, #tpu.memory_space<vmem>>) attributes {dimension_semantics = [#tpu.dimension_semantics<parallel>], iteration_bounds = array<i64: 1>, scalar_prefetch = 0 : i64, scratch_operands = 0 : i64, tpu.core_type = #tpu.core_type<tc>, window_params = [{transform_indices = @transform_0, window_bounds = array<i64: 16, 64>}, {pipeline_mode = #tpu.pipeline_mode<synchronous>, transform_indices = @transform_1, window_bounds = array<i64: 64, 512>}, {pipeline_mode = #tpu.pipeline_mode<synchronous>, transform_indices = @transform_2, window_bounds = array<i64: 1, 512>}, {pipeline_mode = #tpu.pipeline_mode<synchronous>, transform_indices = @transform_3, window_bounds = array<i64: 512, 256>}, {pipeline_mode = #tpu.pipeline_mode<synchronous>, transform_indices = @transform_4, window_bounds = array<i64: 1, 256>}, {pipeline_mode = #tpu.pipeline_mode<synchronous>, transform_indices = @transform_5, window_bounds = array<i64: 256, 128>}, {pipeline_mode = #tpu.pipeline_mode<synchronous>, transform_indices = @transform_6, window_bounds = array<i64: 1, 128>}, {pipeline_mode = #tpu.pipeline_mode<synchronous>, transform_indices = @transform_7, window_bounds = array<i64: 128, 256>}, {pipeline_mode = #tpu.pipeline_mode<synchronous>, transform_indices = @transform_8, window_bounds = array<i64: 1, 256>}, {pipeline_mode = #tpu.pipeline_mode<synchronous>, transform_indices = @transform_9, window_bounds = array<i64: 256, 512>}, {pipeline_mode = #tpu.pipeline_mode<synchronous>, transform_indices = @transform_10, window_bounds = array<i64: 1, 512>}, {pipeline_mode = #tpu.pipeline_mode<synchronous>, transform_indices = @transform_11, window_bounds = array<i64: 512, 128>}, {pipeline_mode = #tpu.pipeline_mode<synchronous>, transform_indices = @transform_12, window_bounds = array<i64: 1, 128>}, {transform_indices = @transform_13, window_bounds = array<i64: 16, 128>}, {transform_indices = @transform_14, window_bounds = array<i64: 16, 128>}]} {
    %c0 = arith.constant 0 : index
    %c0_0 = arith.constant 0 : index
    %0 = vector.load %arg1[%c0, %c0_0] : memref<16x64xf32, #tpu.memory_space<vmem>>, vector<16x64xf32>
    %1 = arith.truncf %0 : vector<16x64xf32> to vector<16x64xbf16>
    %c0_1 = arith.constant 0 : index
    %c0_2 = arith.constant 0 : index
    %2 = vector.load %arg2[%c0_1, %c0_2] : memref<64x512xbf16, #tpu.memory_space<vmem>>, vector<64x512xbf16>
    %cst = arith.constant dense<0.000000e+00> : vector<16x512xf32>
    %3 = tpu.matmul %1, %2, %cst {dimension_numbers = #tpu.dot_dimension_numbers<[1], [0], [0], [1], [0, 0, 1, 1], [], []>} : vector<16x64xbf16>, vector<64x512xbf16>, vector<16x512xf32> -> vector<16x512xf32>
    %c0_3 = arith.constant 0 : index
    %c0_4 = arith.constant 0 : index
    %4 = vector.load %arg3[%c0_3, %c0_4] : memref<1x512xf32, #tpu.memory_space<vmem>>, vector<1x512xf32>
    %5 = vector.broadcast %4 : vector<1x512xf32> to vector<16x512xf32>
    %6 = arith.addf %3, %5 : vector<16x512xf32>
    %cst_5 = arith.constant 0.000000e+00 : f32
    %7 = vector.broadcast %cst_5 : f32 to vector<16x512xf32>
    %8 = arith.maximumf %6, %7 : vector<16x512xf32>
    %9 = arith.truncf %8 : vector<16x512xf32> to vector<16x512xbf16>
    %c0_6 = arith.constant 0 : index
    %c0_7 = arith.constant 0 : index
    %10 = vector.load %arg4[%c0_6, %c0_7] : memref<512x256xbf16, #tpu.memory_space<vmem>>, vector<512x256xbf16>
    %cst_8 = arith.constant dense<0.000000e+00> : vector<16x256xf32>
    %11 = tpu.matmul %9, %10, %cst_8 {dimension_numbers = #tpu.dot_dimension_numbers<[1], [0], [0], [1], [0, 0, 1, 1], [], []>} : vector<16x512xbf16>, vector<512x256xbf16>, vector<16x256xf32> -> vector<16x256xf32>
    %c0_9 = arith.constant 0 : index
    %c0_10 = arith.constant 0 : index
    %12 = vector.load %arg5[%c0_9, %c0_10] : memref<1x256xf32, #tpu.memory_space<vmem>>, vector<1x256xf32>
    %13 = vector.broadcast %12 : vector<1x256xf32> to vector<16x256xf32>
    %14 = arith.addf %11, %13 : vector<16x256xf32>
    %cst_11 = arith.constant 0.000000e+00 : f32
    %15 = vector.broadcast %cst_11 : f32 to vector<16x256xf32>
    %16 = arith.maximumf %14, %15 : vector<16x256xf32>
    %17 = arith.truncf %16 : vector<16x256xf32> to vector<16x256xbf16>
    %c0_12 = arith.constant 0 : index
    %c0_13 = arith.constant 0 : index
    %18 = vector.load %arg6[%c0_12, %c0_13] : memref<256x128xbf16, #tpu.memory_space<vmem>>, vector<256x128xbf16>
    %cst_14 = arith.constant dense<0.000000e+00> : vector<16x128xf32>
    %19 = tpu.matmul %17, %18, %cst_14 {dimension_numbers = #tpu.dot_dimension_numbers<[1], [0], [0], [1], [0, 0, 1, 1], [], []>} : vector<16x256xbf16>, vector<256x128xbf16>, vector<16x128xf32> -> vector<16x128xf32>
    %c0_15 = arith.constant 0 : index
    %c0_16 = arith.constant 0 : index
    %20 = vector.load %arg7[%c0_15, %c0_16] : memref<1x128xf32, #tpu.memory_space<vmem>>, vector<1x128xf32>
    %21 = vector.broadcast %20 : vector<1x128xf32> to vector<16x128xf32>
    %22 = arith.addf %19, %21 : vector<16x128xf32>
    %c0_17 = arith.constant 0 : index
    %c0_18 = arith.constant 0 : index
    %23 = vector.load %arg14[%c0_17, %c0_18] : memref<16x128xf32, #tpu.memory_space<vmem>>, vector<16x128xf32>
    tpu.vector_store %arg14[%c0_17, %c0_18], %22 {strides = array<i32>} : memref<16x128xf32, #tpu.memory_space<vmem>>, vector<16x128xf32>,
    %24 = arith.truncf %22 : vector<16x128xf32> to vector<16x128xbf16>
    %c0_19 = arith.constant 0 : index
    %c0_20 = arith.constant 0 : index
    %25 = vector.load %arg8[%c0_19, %c0_20] : memref<128x256xbf16, #tpu.memory_space<vmem>>, vector<128x256xbf16>
    %cst_21 = arith.constant dense<0.000000e+00> : vector<16x256xf32>
    %26 = tpu.matmul %24, %25, %cst_21 {dimension_numbers = #tpu.dot_dimension_numbers<[1], [0], [0], [1], [0, 0, 1, 1], [], []>} : vector<16x128xbf16>, vector<128x256xbf16>, vector<16x256xf32> -> vector<16x256xf32>
    %c0_22 = arith.constant 0 : index
    %c0_23 = arith.constant 0 : index
    %27 = vector.load %arg9[%c0_22, %c0_23] : memref<1x256xf32, #tpu.memory_space<vmem>>, vector<1x256xf32>
    %28 = vector.broadcast %27 : vector<1x256xf32> to vector<16x256xf32>
    %29 = arith.addf %26, %28 : vector<16x256xf32>
    %cst_24 = arith.constant 0.000000e+00 : f32
    %30 = vector.broadcast %cst_24 : f32 to vector<16x256xf32>
    %31 = arith.maximumf %29, %30 : vector<16x256xf32>
    %32 = arith.truncf %31 : vector<16x256xf32> to vector<16x256xbf16>
    %c0_25 = arith.constant 0 : index
    %c0_26 = arith.constant 0 : index
    %33 = vector.load %arg10[%c0_25, %c0_26] : memref<256x512xbf16, #tpu.memory_space<vmem>>, vector<256x512xbf16>
    %cst_27 = arith.constant dense<0.000000e+00> : vector<16x512xf32>
    %34 = tpu.matmul %32, %33, %cst_27 {dimension_numbers = #tpu.dot_dimension_numbers<[1], [0], [0], [1], [0, 0, 1, 1], [], []>} : vector<16x256xbf16>, vector<256x512xbf16>, vector<16x512xf32> -> vector<16x512xf32>
    %c0_28 = arith.constant 0 : index
    %c0_29 = arith.constant 0 : index
    %35 = vector.load %arg11[%c0_28, %c0_29] : memref<1x512xf32, #tpu.memory_space<vmem>>, vector<1x512xf32>
    %36 = vector.broadcast %35 : vector<1x512xf32> to vector<16x512xf32>
    %37 = arith.addf %34, %36 : vector<16x512xf32>
    %cst_30 = arith.constant 0.000000e+00 : f32
    %38 = vector.broadcast %cst_30 : f32 to vector<16x512xf32>
    %39 = arith.maximumf %37, %38 : vector<16x512xf32>
    %40 = arith.truncf %39 : vector<16x512xf32> to vector<16x512xbf16>
    %c0_31 = arith.constant 0 : index
    %c0_32 = arith.constant 0 : index
    %41 = vector.load %arg12[%c0_31, %c0_32] : memref<512x128xbf16, #tpu.memory_space<vmem>>, vector<512x128xbf16>
    %cst_33 = arith.constant dense<0.000000e+00> : vector<16x128xf32>
    %42 = tpu.matmul %40, %41, %cst_33 {dimension_numbers = #tpu.dot_dimension_numbers<[1], [0], [0], [1], [0, 0, 1, 1], [], []>} : vector<16x512xbf16>, vector<512x128xbf16>, vector<16x128xf32> -> vector<16x128xf32>
    %c0_34 = arith.constant 0 : index
    %c0_35 = arith.constant 0 : index
    %43 = vector.load %arg13[%c0_34, %c0_35] : memref<1x128xf32, #tpu.memory_space<vmem>>, vector<1x128xf32>
    %44 = vector.broadcast %43 : vector<1x128xf32> to vector<16x128xf32>
    %45 = arith.addf %42, %44 : vector<16x128xf32>
    %c0_36 = arith.constant 0 : index
    %c0_37 = arith.constant 0 : index
    %46 = vector.load %arg15[%c0_36, %c0_37] : memref<16x128xf32, #tpu.memory_space<vmem>>, vector<16x128xf32>
    tpu.vector_store %arg15[%c0_36, %c0_37], %45 {strides = array<i32>} : memref<16x128xf32, #tpu.memory_space<vmem>>, vector<16x128xf32>,
    return
  }
  func.func @transform_0(%arg0: i32) -> (i32, i32) {
    %c0_i32 = arith.constant 0 : i32
    %c0_i32_0 = arith.constant 0 : i32
    return %arg0, %c0_i32 : i32, i32
  }
  func.func @transform_1(%arg0: i32) -> (i32, i32) {
    %c0_i32 = arith.constant 0 : i32
    %c0_i32_0 = arith.constant 0 : i32
    %c0_i32_1 = arith.constant 0 : i32
    return %c0_i32, %c0_i32_0 : i32, i32
  }
  func.func @transform_2(%arg0: i32) -> (i32, i32) {
    %c0_i32 = arith.constant 0 : i32
    %c0_i32_0 = arith.constant 0 : i32
    %c0_i32_1 = arith.constant 0 : i32
    return %c0_i32, %c0_i32_0 : i32, i32
  }
  func.func @transform_3(%arg0: i32) -> (i32, i32) {
    %c0_i32 = arith.constant 0 : i32
    %c0_i32_0 = arith.constant 0 : i32
    %c0_i32_1 = arith.constant 0 : i32
    return %c0_i32, %c0_i32_0 : i32, i32
  }
  func.func @transform_4(%arg0: i32) -> (i32, i32) {
    %c0_i32 = arith.constant 0 : i32
    %c0_i32_0 = arith.constant 0 : i32
    %c0_i32_1 = arith.constant 0 : i32
    return %c0_i32, %c0_i32_0 : i32, i32
  }
  func.func @transform_5(%arg0: i32) -> (i32, i32) {
    %c0_i32 = arith.constant 0 : i32
    %c0_i32_0 = arith.constant 0 : i32
    %c0_i32_1 = arith.constant 0 : i32
    return %c0_i32, %c0_i32_0 : i32, i32
  }
  func.func @transform_6(%arg0: i32) -> (i32, i32) {
    %c0_i32 = arith.constant 0 : i32
    %c0_i32_0 = arith.constant 0 : i32
    %c0_i32_1 = arith.constant 0 : i32
    return %c0_i32, %c0_i32_0 : i32, i32
  }
  func.func @transform_7(%arg0: i32) -> (i32, i32) {
    %c0_i32 = arith.constant 0 : i32
    %c0_i32_0 = arith.constant 0 : i32
    %c0_i32_1 = arith.constant 0 : i32
    return %c0_i32, %c0_i32_0 : i32, i32
  }
  func.func @transform_8(%arg0: i32) -> (i32, i32) {
    %c0_i32 = arith.constant 0 : i32
    %c0_i32_0 = arith.constant 0 : i32
    %c0_i32_1 = arith.constant 0 : i32
    return %c0_i32, %c0_i32_0 : i32, i32
  }
  func.func @transform_9(%arg0: i32) -> (i32, i32) {
    %c0_i32 = arith.constant 0 : i32
    %c0_i32_0 = arith.constant 0 : i32
    %c0_i32_1 = arith.constant 0 : i32
    return %c0_i32, %c0_i32_0 : i32, i32
  }
  func.func @transform_10(%arg0: i32) -> (i32, i32) {
    %c0_i32 = arith.constant 0 : i32
    %c0_i32_0 = arith.constant 0 : i32
    %c0_i32_1 = arith.constant 0 : i32
    return %c0_i32, %c0_i32_0 : i32, i32
  }
  func.func @transform_11(%arg0: i32) -> (i32, i32) {
    %c0_i32 = arith.constant 0 : i32
    %c0_i32_0 = arith.constant 0 : i32
    %c0_i32_1 = arith.constant 0 : i32
    return %c0_i32, %c0_i32_0 : i32, i32
  }
  func.func @transform_12(%arg0: i32) -> (i32, i32) {
    %c0_i32 = arith.constant 0 : i32
    %c0_i32_0 = arith.constant 0 : i32
    %c0_i32_1 = arith.constant 0 : i32
    return %c0_i32, %c0_i32_0 : i32, i32
  }
  func.func @transform_13(%arg0: i32) -> (i32, i32) {
    %c0_i32 = arith.constant 0 : i32
    %c0_i32_0 = arith.constant 0 : i32
    return %arg0, %c0_i32 : i32, i32
  }
  func.func @transform_14(%arg0: i32) -> (i32, i32) {
    %c0_i32 = arith.constant 0 : i32
    %c0_i32_0 = arith.constant 0 : i32
    return %arg0, %c0_i32 : i32, i32
  }
}

</mosaic_0001>

<bundles_post_ra>
// kernel: _ae_forward_impl.1
= control target key start
LH: loop header
LB: loop body
LE: loop exit
PB: predicated region body
PF: predicated region fallthrough
CT: control target
= control target key end

     0   :  { %20 = vsyncpa [#allocation3], 0  ;;  %s3547_s0 = inlined_call_operand.hbm [shape: f32[16,64], index: 0, kind: input, shape index: {}]   ;;  %s3548_s1 = inlined_call_operand.hbm [shape: bf16[64,512], index: 1, kind: input, shape index: {}]   ;;  %s3549_s2 = inlined_call_operand.hbm [shape: f32[1,512], index: 2, kind: input, shape index: {}]   ;;  %s3550_s3 = inlined_call_operand.hbm [shape: bf16[512,256], index: 3, kind: input, shape index: {}]   ;;  %s3551_s4 = inlined_call_operand.vmem [shape: f32[1,256], index: 4, kind: input, shape index: {}]   ;;  %s3552_s5 = inlined_call_operand.hbm [shape: bf16[256,128], index: 5, kind: input, shape index: {}]   ;;  %s3553_s6 = inlined_call_operand.vmem [shape: f32[1,128], index: 6, kind: input, shape index: {}]   ;;  %s3554_s7 = inlined_call_operand.hbm [shape: bf16[128,256], index: 7, kind: input, shape index: {}]   ;;  %s3555_s8 = inlined_call_operand.hbm [shape: f32[1,256], index: 8, kind: input, shape index: {}]   ;;  %s3556_s9 = inlined_call_operand.hbm [shape: bf16[256,512], index: 9, kind: input, shape index: {}]   ;;  %s3557_s10 = inlined_call_operand.vmem [shape: f32[1,512], index: 10, kind: input, shape index: {}]   ;;  %s3558_s11 = inlined_call_operand.hbm [shape: bf16[512,128], index: 11, kind: input, shape index: {}]   ;;  %s3559_s12 = inlined_call_operand.vmem [shape: f32[1,128], index: 12, kind: input, shape index: {}]   ;;  %s3560_s13 = inlined_call_operand.hbm [shape: f32[16,128], index: 13, kind: output, shape index: {0}]   ;;  %s3561_s14 = inlined_call_operand.hbm [shape: f32[16,128], index: 14, kind: output, shape index: {1}]  }
   0x1   :  { %21 = vsyncpa [#allocation6], 0 }
   0x2   :  { %22 = vsyncpa [#allocation9], 0 }
   0x3   :  { %23 = vsyncpa [#allocation12], 0 }
   0x4   :  { %24 = vsyncpa [#allocation15], 0 }
   0x5   :  { %25 = vsyncpa [#allocation4], 0  ;;  %s44_s15 = sshll.u32 %s3548_s1, 4  ;;  %s45_s15 = int_to_ptr.hbm [resolvable:$true] %s44_s15 }
   0x6   :  { %26 = vsyncpa [#allocation19], 0  ;;  %s3391_s16 = smov [#allocation5]   ;;  %s3392_s18 = smov 256  }
   0x7   :  { %s46_s17 = sshll.u32 %s3391_s16, 4  ;;  %s3393_s19 = smov 16   ;;  %s47_s17 = int_to_ptr.vmem [resolvable:$true] %s46_s17 }
   0x8   :  { %52 = dma.hbm_to_vmem [thread:$0]  %s45_s15, 2048, %s47_s17, [#allocation6], %s3392_s18, %s3392_s18, %s3393_s19  }
   0x9   :  { %s68_s22 = sshll.u32 %s3550_s3, 4  ;;  %s3394_s23 = smov [#allocation8]   ;;  %s69_s22 = int_to_ptr.hbm [resolvable:$true] %s68_s22 }
   0xa   :  { %s70_s24 = sshll.u32 %s3394_s23, 4  ;;  %s98_s27 = sshll.u32 %s3554_s7, 4  ;;  %s71_s24 = int_to_ptr.vmem [resolvable:$true] %s70_s24  ;;  %s99_s27 = int_to_ptr.hbm [resolvable:$true] %s98_s27 }
   0xb   :  { %s3395_s1 = smov 128   ;;  %s3396_s28 = smov 8  }
   0xc   :  { %76 = dma.hbm_to_vmem [thread:$0]  %s69_s22, 8192, %s71_s24, [#allocation9], %s3395_s1, %s3395_s1, %s3396_s28  }
   0xd   :  { %s122_s15 = sshll.u32 %s3556_s9, 4  ;;  %s3397_s3 = smov [#allocation11]   ;;  %s123_s15 = int_to_ptr.hbm [resolvable:$true] %s122_s15 }
   0xe   :  { %s100_s16 = sshll.u32 %s3397_s3, 4  ;;  %s3398_s7 = smov [#allocation14]   ;;  %s101_s16 = int_to_ptr.vmem [resolvable:$true] %s100_s16 }
   0xf   :  { %106 = dma.hbm_to_vmem [thread:$0]  %s99_s27, 2048, %s101_s16, [#allocation12], %s3395_s1, %s3395_s1, %s3396_s28  }
  0x10   :  { %s124_s17 = sshll.u32 %s3398_s7, 4  ;;  %s31_s23 = sshll.u32 %s3547_s0, 4  ;;  %s125_s17 = int_to_ptr.vmem [resolvable:$true] %s124_s17  ;;  %s32_s23 = int_to_ptr.hbm [resolvable:$true] %s31_s23 }
  0x11   :  { %130 = dma.hbm_to_vmem [thread:$0]  %s123_s15, 8192, %s125_s17, [#allocation15], %s3392_s18, %s3392_s18, %s3393_s19  }
  0x12   :  { %s58_s9 = sshll.u32 %s3549_s2, 4  ;;  %s3399_s25 = smov [#allocation2]   ;;  %s59_s9 = int_to_ptr.hbm [resolvable:$true] %s58_s9 }
  0x13   :  { %s33_s26 = sshll.u32 %s3399_s25, 4  ;;  %s3400_s27 = smov [#allocation7]   ;;  %s34_s26 = int_to_ptr.vmem [resolvable:$true] %s33_s26 }
  0x14   :  { %39 = dma.hbm_to_vmem [thread:$0]  %s32_s23, 256, %s34_s26, [#allocation3], %s3395_s1, %s3395_s1, %s3396_s28  }
  0x15   :  { %s60_s29 = sshll.u32 %s3400_s27, 4  ;;  %s83_s0 = sshll.u32 %s3552_s5, 4  ;;  %s61_s29 = int_to_ptr.vmem [resolvable:$true] %s60_s29  ;;  %s84_s0 = int_to_ptr.hbm [resolvable:$true] %s83_s0 }
  0x16   :  { %63 = dma.hbm_to_vmem [thread:$0]  %s59_s9, 64, %s61_s29, [#allocation6]  }
  0x17   :  { %s3401_s18 = smov [#allocation10]   ;;  %s112_s16 = sshll.u32 %s3555_s8, 4  ;;  %s113_s16 = int_to_ptr.hbm [resolvable:$true] %s112_s16 }
  0x18   :  { %s85_s19 = sshll.u32 %s3401_s18, 4  ;;  %s3402_s7 = smov 64   ;;  %s86_s19 = int_to_ptr.vmem [resolvable:$true] %s85_s19 }
  0x19   :  { %s3403_s17 = smov 4   ;;  %s3404_s20 = smov [#allocation13]  }
  0x1a   :  { %91 = dma.hbm_to_vmem [thread:$0]  %s84_s0, 2048, %s86_s19, [#allocation9], %s3402_s7, %s3402_s7, %s3403_s17  }
  0x1b   :  { %s114_s21 = sshll.u32 %s3404_s20, 4  ;;  %s137_s5 = sshll.u32 %s3558_s11, 4  ;;  %s115_s21 = int_to_ptr.vmem [resolvable:$true] %s114_s21  ;;  %s138_s5 = int_to_ptr.hbm [resolvable:$true] %s137_s5 }
  0x1c   :  { %117 = dma.hbm_to_vmem [thread:$0]  %s113_s16, 32, %s115_s21, [#allocation12]  }
  0x1d   :  { %s3405_s24 = smov [#allocation16]  }
  0x1e   :  { %s139_s9 = sshll.u32 %s3405_s24, 4  ;;  %s140_s9 = int_to_ptr.vmem [resolvable:$true] %s139_s9 }
  0x1f   :  { %145 = dma.hbm_to_vmem [thread:$0]  %s138_s5, 4096, %s140_s9, [#allocation15], %s3402_s7, %s3402_s7, %s3403_s17  }
  0x20   :  { %3377 = dma.done.wait [#allocation3], 256  }
  0x21   :  { %3378 = vsyncadd [#allocation3], 4294967040 }
  0x22   :  { %3379 = dma.done.wait [#allocation6], 2112  }
  0x23   :  { %3380 = vsyncadd [#allocation6], 4294965184 }
  0x24   :  { %3381 = dma.done.wait [#allocation9], 10240  }
  0x25   :  { %3382 = vsyncadd [#allocation9], 4294957056 }
  0x26   :  { %3383 = dma.done.wait [#allocation12], 2080  }
  0x27   :  { %3384 = vsyncadd [#allocation12], 4294965216 }
  0x28   :  { %3385 = dma.done.wait [#allocation15], 12288  }
  0x29   :  { %3386 = vsyncadd [#allocation15], 4294955008  ;;  %v2100_v0 = vld [vmem:[#allocation5 + $0x60] sm:$0xf]  ;;  %v2900_v1 = vld [vmem:[#allocation5 + $0x6c] sm:$0xf0] }
  0x2a   :  { %v2898_v2 = vld [vmem:[#allocation5 + $0x64] sm:$0xf]  ;;  %v2101_v3 = vor.u32 %v2900_v1, %v2100_v0  ;;  %v2102_v4 = vld [vmem:[#allocation5 + $0x70] sm:$0xf0]  ;;  %v2108_v5 = vld [vmem:[#allocation5 + $0x68] sm:$0xf] }
  0x2b   :  { %v2901_v6 = vld [vmem:[#allocation5 + $0x74] sm:$0xf0]  ;;  %v2105_v7 = vor.u32 %v2898_v2, %v2102_v4  ;;  %v2899_v9 = vld [vmem:[#allocation5 + $0x6c] sm:$0xf]  ;;  %v2110_v10 = vld [vmem:[#allocation5 + $0x78] sm:$0xf0] }
  0x2c   :  { %v2109_v8 = vor.u32 %v2901_v6, %v2108_v5  ;;  %v2084_v11 = vld [vmem:[#allocation5 + $0x40] sm:$0xf]  ;;  %302 = vmatpush.bf16.msra.mxu0 %v2101_v3  ;;  %v2113_v12 = vor.u32 %v2899_v9, %v2110_v10  ;;  %v2896_v13 = vld [vmem:[#allocation5 + $0x4c] sm:$0xf0]  ;;  %v2894_v14 = vld [vmem:[#allocation5 + $0x44] sm:$0xf] }
  0x2d   :  { %v2086_v15 = vld [vmem:[#allocation5 + $0x50] sm:$0xf0]  ;;  %316 = vmatpush.bf16.msra.mxu1 %v2105_v7  ;;  %v2085_v16 = vor.u32 %v2896_v13, %v2084_v11  ;;  %v2092_v18 = vld [vmem:[#allocation5 + $0x48] sm:$0xf]  ;;  %v2897_v19 = vld [vmem:[#allocation5 + $0x54] sm:$0xf0] }
  0x2e   :  { %330 = vmatpush.bf16.msra.mxu2 %v2109_v8  ;;  %v2089_v17 = vor.u32 %v2894_v14, %v2086_v15  ;;  %v2895_v20 = vld [vmem:[#allocation5 + $0x4c] sm:$0xf]  ;;  %344 = vmatpush.bf16.msra.mxu3 %v2113_v12  ;;  %v2093_v21 = vor.u32 %v2897_v19, %v2092_v18  ;;  %v2094_v22 = vld [vmem:[#allocation5 + $0x58] sm:$0xf0]  ;;  %v2068_v23 = vld [vmem:[#allocation5 + $0x20] sm:$0xf] }
  0x2f   :  { %v2892_v24 = vld [vmem:[#allocation5 + $0x2c] sm:$0xf0]  ;;  %v2097_v25 = vor.u32 %v2895_v20, %v2094_v22  ;;  %v2890_v26 = vld [vmem:[#allocation5 + $0x24] sm:$0xf]  ;;  %v2070_v27 = vld [vmem:[#allocation5 + $0x30] sm:$0xf0] }
  0x30   :  { %v2076_v28 = vld [vmem:[#allocation5 + $0x28] sm:$0xf]  ;;  %303 = vmatpush.bf16.msra.mxu0 %v2085_v16  ;;  %v2069_v29 = vor.u32 %v2892_v24, %v2068_v23  ;;  %v2893_v30 = vld [vmem:[#allocation5 + $0x34] sm:$0xf0]  ;;  %v2891_v31 = vld [vmem:[#allocation5 + $0x2c] sm:$0xf]  ;;  %v2073_v33 = vor.u32 %v2890_v26, %v2070_v27 }
  0x31   :  { %v2078_v32 = vld [vmem:[#allocation5 + $0x38] sm:$0xf0]  ;;  %317 = vmatpush.bf16.msra.mxu1 %v2089_v17  ;;  %v2077_v34 = vor.u32 %v2893_v30, %v2076_v28  ;;  %v2052_v35 = vld [vmem:[#allocation5] sm:$0xf]  ;;  %v2888_v36 = vld [vmem:[#allocation5 + $0xc] sm:$0xf0] }
  0x32   :  { %331 = vmatpush.bf16.msra.mxu2 %v2093_v21  ;;  %v2886_v37 = vld [vmem:[#allocation5 + $0x4] sm:$0xf]  ;;  %345 = vmatpush.bf16.msra.mxu3 %v2097_v25  ;;  %v2081_v38 = vor.u32 %v2891_v31, %v2078_v32  ;;  %v2054_v39 = vld [vmem:[#allocation5 + $0x10] sm:$0xf0]  ;;  %v2060_v40 = vld [vmem:[#allocation5 + $0x8] sm:$0xf]  ;;  %v2053_v45 = vor.u32 %v2888_v36, %v2052_v35 }
  0x33   :  { %v2889_v41 = vld [vmem:[#allocation5 + $0x14] sm:$0xf0]  ;;  %v2887_v42 = vld [vmem:[#allocation5 + $0xc] sm:$0xf]  ;;  %v2062_v43 = vld [vmem:[#allocation5 + $0x18] sm:$0xf0]  ;;  %v2057_v49 = vor.u32 %v2886_v37, %v2054_v39 }
  0x34   :  { %v185_v44 = vld [vmem:[#allocation2] sm:$0xff]  ;;  %304 = vmatpush.bf16.msra.mxu0 %v2069_v29  ;;  %v186_v46 = vld [vmem:[#allocation2 + $0x8] sm:$0xff]  ;;  %v2061_v50 = vor.u32 %v2889_v41, %v2060_v40  ;;  %v2065_v53 = vor.u32 %v2887_v42, %v2062_v43  ;;  %vm294_vm0 = vcmask 523264   ;;  %v2168_v55 = vld [vmem:[#allocation8 + $0x60] sm:$0xf]  ;;  %s2015_s3 = sshll.u32 %s3560_s13, 4  ;;  %s2016_s3 = int_to_ptr.hbm [resolvable:$true] %s2015_s3 }
  0x35   :  { %v2176_v47 = vld [vmem:[#allocation8 + $0x70] sm:$0xf]  ;;  %v2917_v48 = vld [vmem:[#allocation8 + $0x74] sm:$0xf0]  ;;  %318 = vmatpush.bf16.msra.mxu1 %v2073_v33  ;;  %v2915_v56 = vld [vmem:[#allocation8 + $0x64] sm:$0xf0]  ;;  %v187_v57 = vpack.c.bf16 %v186_v46, %v185_v44 }
  0x36   :  { %332 = vmatpush.bf16.msra.mxu2 %v2077_v34  ;;  %v2240_v51 = vld [vmem:[#allocation8 + $0xf0] sm:$0xf]  ;;  %v2933_v52 = vld [vmem:[#allocation8 + $0xf4] sm:$0xf0]  ;;  %346 = vmatpush.bf16.msra.mxu3 %v2081_v38  ;;  %v2177_v54 = vor.u32 %v2917_v48, %v2176_v47  ;;  %v2232_v62 = vld [vmem:[#allocation8 + $0xe0] sm:$0xf]  ;;  %v2169_v2 = vor.u32 %v2915_v56, %v2168_v55 }
  0x37   :  { %v2241_v58 = vor.u32 %v2933_v52, %v2240_v51  ;;  %v2304_v59 = vld [vmem:[#allocation8 + $0x170] sm:$0xf]  ;;  %v2949_v60 = vld [vmem:[#allocation8 + $0x174] sm:$0xf0]  ;;  %v2931_v63 = vld [vmem:[#allocation8 + $0xe4] sm:$0xf0] }
  0x38   :  { %v2368_v61 = vld [vmem:[#allocation8 + $0x1f0] sm:$0xf]  ;;  %305 = vmatpush.bf16.msra.mxu0 %v2053_v45  ;;  %v2965_v0 = vld [vmem:[#allocation8 + $0x1f4] sm:$0xf0]  ;;  %v2305_v1 = vor.u32 %v2949_v60, %v2304_v59  ;;  %v2296_v5 = vld [vmem:[#allocation8 + $0x160] sm:$0xf]  ;;  %v2233_v7 = vor.u32 %v2931_v63, %v2232_v62 }
  0x39   :  { %319 = vmatpush.bf16.msra.mxu1 %v2057_v49  ;;  %v2369_v3 = vor.u32 %v2965_v0, %v2368_v61  ;;  %v2160_v4 = vld [vmem:[#allocation8 + $0x50] sm:$0xf]  ;;  %v2947_v6 = vld [vmem:[#allocation8 + $0x164] sm:$0xf0]  ;;  %v2913_v8 = vld [vmem:[#allocation8 + $0x54] sm:$0xf0] }
  0x3a   :  { %333 = vmatpush.bf16.msra.mxu2 %v2061_v50  ;;  %347 = vmatpush.bf16.msra.mxu3 %v2065_v53  ;;  %v2360_v9 = vld [vmem:[#allocation8 + $0x1e0] sm:$0xf]  ;;  %v2963_v10 = vld [vmem:[#allocation8 + $0x1e4] sm:$0xf0]  ;;  %v2224_v11 = vld [vmem:[#allocation8 + $0xd0] sm:$0xf]  ;;  %v2297_v13 = vor.u32 %v2947_v6, %v2296_v5  ;;  %v2161_v14 = vor.u32 %v2913_v8, %v2160_v4 }
  0x3b   :  { %2114 = vmatmul.msk.bf16.vlgmr.msra.gmra.mxu0 %vm294_vm0, %v187_v57  ;;  %v2929_v12 = vld [vmem:[#allocation8 + $0xd4] sm:$0xf0]  ;;  %v2361_v15 = vor.u32 %v2963_v10, %v2360_v9  ;;  %v2152_v16 = vld [vmem:[#allocation8 + $0x40] sm:$0xf]  ;;  %v2288_v17 = vld [vmem:[#allocation8 + $0x150] sm:$0xf] }
  0x3c   :  { %756 = vmatpush.bf16.msrb.mxu0 %v2177_v54  ;;  %2115 = vmatmul.msk.bf16.vlgmr.msra.gmra.mxu1 %vm294_vm0, %v187_v57  ;;  %v2945_v18 = vld [vmem:[#allocation8 + $0x154] sm:$0xf0]  ;;  %v2225_v19 = vor.u32 %v2929_v12, %v2224_v11  ;;  %v2911_v20 = vld [vmem:[#allocation8 + $0x44] sm:$0xf0]  ;;  %v2352_v21 = vld [vmem:[#allocation8 + $0x1d0] sm:$0xf] }
  0x3d   :  { %770 = vmatpush.bf16.msrb.mxu1 %v2241_v58  ;;  %2116 = vmatmul.msk.bf16.vlgmr.msra.gmra.mxu2 %vm294_vm0, %v187_v57  ;;  %v2961_v22 = vld [vmem:[#allocation8 + $0x1d4] sm:$0xf0]  ;;  %v2216_v23 = vld [vmem:[#allocation8 + $0xc0] sm:$0xf]  ;;  %v2927_v24 = vld [vmem:[#allocation8 + $0xc4] sm:$0xf0]  ;;  %v2289_v25 = vor.u32 %v2945_v18, %v2288_v17  ;;  %v2153_v26 = vor.u32 %v2911_v20, %v2152_v16 }
  0x3e   :  { %2117 = vmatmul.msk.bf16.vlgmr.msra.gmra.mxu3 %vm294_vm0, %v187_v57  ;;  %784 = vmatpush.bf16.msrb.mxu2 %v2305_v1  ;;  %v2353_v27 = vor.u32 %v2961_v22, %v2352_v21  ;;  %v2144_v28 = vld [vmem:[#allocation8 + $0x30] sm:$0xf]  ;;  %v2280_v29 = vld [vmem:[#allocation8 + $0x140] sm:$0xf]  ;;  %v2943_v30 = vld [vmem:[#allocation8 + $0x144] sm:$0xf0]  ;;  %v2217_v31 = vor.u32 %v2927_v24, %v2216_v23 }
  0x3f   :  { %798 = vmatpush.bf16.msrb.mxu3 %v2369_v3  ;;  %v2909_v32 = vld [vmem:[#allocation8 + $0x34] sm:$0xf0]  ;;  %v2344_v33 = vld [vmem:[#allocation8 + $0x1c0] sm:$0xf]  ;;  %v2959_v34 = vld [vmem:[#allocation8 + $0x1c4] sm:$0xf0]  ;;  %v2281_v37 = vor.u32 %v2943_v30, %v2280_v29 }
  0x40   :  { %757 = vmatpush.bf16.msrb.mxu0 %v2169_v2  ;;  %v2208_v35 = vld [vmem:[#allocation8 + $0xb0] sm:$0xf]  ;;  %v2925_v36 = vld [vmem:[#allocation8 + $0xb4] sm:$0xf0]  ;;  %v2136_v38 = vld [vmem:[#allocation8 + $0x20] sm:$0xf]  ;;  %v2145_v40 = vor.u32 %v2909_v32, %v2144_v28  ;;  %v2345_v41 = vor.u32 %v2959_v34, %v2344_v33 }
  0x41   :  { %771 = vmatpush.bf16.msrb.mxu1 %v2233_v7  ;;  %v2907_v39 = vld [vmem:[#allocation8 + $0x24] sm:$0xf0]  ;;  %v2272_v42 = vld [vmem:[#allocation8 + $0x130] sm:$0xf]  ;;  %v2941_v43 = vld [vmem:[#allocation8 + $0x134] sm:$0xf0]  ;;  %v2209_v45 = vor.u32 %v2925_v36, %v2208_v35 }
  0x42   :  { %785 = vmatpush.bf16.msrb.mxu2 %v2297_v13  ;;  %v2336_v44 = vld [vmem:[#allocation8 + $0x1b0] sm:$0xf]  ;;  %v2957_v46 = vld [vmem:[#allocation8 + $0x1b4] sm:$0xf0]  ;;  %v2200_v47 = vld [vmem:[#allocation8 + $0xa0] sm:$0xf]  ;;  %v2273_v49 = vor.u32 %v2941_v43, %v2272_v42  ;;  %v2137_v50 = vor.u32 %v2907_v39, %v2136_v38 }
  0x43   :  { %799 = vmatpush.bf16.msrb.mxu3 %v2361_v15  ;;  %v2923_v48 = vld [vmem:[#allocation8 + $0xa4] sm:$0xf0]  ;;  %v2337_v51 = vor.u32 %v2957_v46, %v2336_v44  ;;  %v2128_v52 = vld [vmem:[#allocation8 + $0x10] sm:$0xf]  ;;  %v2264_v53 = vld [vmem:[#allocation8 + $0x120] sm:$0xf] }
  0x44   :  { %758 = vmatpush.bf16.msrb.mxu0 %v2161_v14  ;;  %v2939_v54 = vld [vmem:[#allocation8 + $0x124] sm:$0xf0]  ;;  %v2201_v55 = vor.u32 %v2923_v48, %v2200_v47  ;;  %v2905_v56 = vld [vmem:[#allocation8 + $0x14] sm:$0xf0]  ;;  %v2328_v57 = vld [vmem:[#allocation8 + $0x1a0] sm:$0xf] }
  0x45   :  { %772 = vmatpush.bf16.msrb.mxu1 %v2225_v19  ;;  %v2955_v58 = vld [vmem:[#allocation8 + $0x1a4] sm:$0xf0]  ;;  %v2192_v59 = vld [vmem:[#allocation8 + $0x90] sm:$0xf]  ;;  %v2921_v60 = vld [vmem:[#allocation8 + $0x94] sm:$0xf0]  ;;  %v2265_v61 = vor.u32 %v2939_v54, %v2264_v53  ;;  %v2129_v62 = vor.u32 %v2905_v56, %v2128_v52 }
  0x46   :  { %786 = vmatpush.bf16.msrb.mxu2 %v2289_v25  ;;  %v2329_v63 = vor.u32 %v2955_v58, %v2328_v57  ;;  %v2193_v0 = vor.u32 %v2921_v60, %v2192_v59  ;;  %v2120_v1 = vld [vmem:[#allocation8] sm:$0xf]  ;;  %v2903_v2 = vld [vmem:[#allocation8 + $0x4] sm:$0xf0]  ;;  %v2916_v7 = vld [vmem:[#allocation8 + $0x74] sm:$0xf] }
  0x47   :  { %800 = vmatpush.bf16.msrb.mxu3 %v2353_v27  ;;  %v2184_v3 = vld [vmem:[#allocation8 + $0x80] sm:$0xf]  ;;  %v2919_v4 = vld [vmem:[#allocation8 + $0x84] sm:$0xf0]  ;;  %v2121_v5 = vor.u32 %v2903_v2, %v2120_v1  ;;  %v2178_v8 = vld [vmem:[#allocation8 + $0x78] sm:$0xf0] }
  0x48   :  { %759 = vmatpush.bf16.msrb.mxu0 %v2153_v26  ;;  %v2185_v6 = vor.u32 %v2919_v4, %v2184_v3  ;;  %v2932_v9 = vld [vmem:[#allocation8 + $0xf4] sm:$0xf]  ;;  %v2181_v10 = vor.u32 %v2916_v7, %v2178_v8  ;;  %v2242_v11 = vld [vmem:[#allocation8 + $0xf8] sm:$0xf0]  ;;  %v2256_v12 = vld [vmem:[#allocation8 + $0x110] sm:$0xf] }
  0x49   :  { %773 = vmatpush.bf16.msrb.mxu1 %v2217_v31  ;;  %v2937_v13 = vld [vmem:[#allocation8 + $0x114] sm:$0xf0]  ;;  %v2245_v14 = vor.u32 %v2932_v9, %v2242_v11  ;;  %v2320_v16 = vld [vmem:[#allocation8 + $0x190] sm:$0xf]  ;;  %v2914_v19 = vld [vmem:[#allocation8 + $0x64] sm:$0xf] }
  0x4a   :  { %787 = vmatpush.bf16.msrb.mxu2 %v2281_v37  ;;  %v2257_v15 = vor.u32 %v2937_v13, %v2256_v12  ;;  %v2953_v17 = vld [vmem:[#allocation8 + $0x194] sm:$0xf0]  ;;  %v2170_v20 = vld [vmem:[#allocation8 + $0x68] sm:$0xf0]  ;;  %v2930_v22 = vld [vmem:[#allocation8 + $0xe4] sm:$0xf] }
  0x4b   :  { %801 = vmatpush.bf16.msrb.mxu3 %v2345_v41  ;;  %v2321_v18 = vor.u32 %v2953_v17, %v2320_v16  ;;  %v2173_v21 = vor.u32 %v2914_v19, %v2170_v20  ;;  %v2234_v23 = vld [vmem:[#allocation8 + $0xe8] sm:$0xf0]  ;;  %v2248_v24 = vld [vmem:[#allocation8 + $0x100] sm:$0xf]  ;;  %v2935_v26 = vld [vmem:[#allocation8 + $0x104] sm:$0xf0] }
  0x4c   :  { %760 = vmatpush.bf16.msrb.mxu0 %v2145_v40  ;;  %v2237_v25 = vor.u32 %v2930_v22, %v2234_v23  ;;  %v2312_v27 = vld [vmem:[#allocation8 + $0x180] sm:$0xf]  ;;  %v2951_v28 = vld [vmem:[#allocation8 + $0x184] sm:$0xf0]  ;;  %v2249_v29 = vor.u32 %v2935_v26, %v2248_v24  ;;  %v2948_v31 = vld [vmem:[#allocation8 + $0x174] sm:$0xf] }
  0x4d   :  { %774 = vmatpush.bf16.msrb.mxu1 %v2209_v45  ;;  %v2313_v30 = vor.u32 %v2951_v28, %v2312_v27  ;;  %v2306_v32 = vld [vmem:[#allocation8 + $0x178] sm:$0xf0]  ;;  %v2964_v34 = vld [vmem:[#allocation8 + $0x1f4] sm:$0xf]  ;;  %v2946_v43 = vld [vmem:[#allocation8 + $0x164] sm:$0xf] }
  0x4e   :  { %788 = vmatpush.bf16.msrb.mxu2 %v2273_v49  ;;  %v2309_v33 = vor.u32 %v2948_v31, %v2306_v32  ;;  %v2370_v35 = vld [vmem:[#allocation8 + $0x1f8] sm:$0xf0]  ;;  %v2912_v36 = vld [vmem:[#allocation8 + $0x54] sm:$0xf]  ;;  %v2298_v44 = vld [vmem:[#allocation8 + $0x168] sm:$0xf0] }
  0x4f   :  { %802 = vmatpush.bf16.msrb.mxu3 %v2337_v51  ;;  %v2373_v37 = vor.u32 %v2964_v34, %v2370_v35  ;;  %v2162_v38 = vld [vmem:[#allocation8 + $0x58] sm:$0xf0]  ;;  %v2928_v39 = vld [vmem:[#allocation8 + $0xd4] sm:$0xf]  ;;  %v2301_v45 = vor.u32 %v2946_v43, %v2298_v44  ;;  %v2962_v46 = vld [vmem:[#allocation8 + $0x1e4] sm:$0xf] }
  0x50   :  { %761 = vmatpush.bf16.msrb.mxu0 %v2137_v50  ;;  %v2226_v40 = vld [vmem:[#allocation8 + $0xd8] sm:$0xf0]  ;;  %v2165_v41 = vor.u32 %v2912_v36, %v2162_v38  ;;  %v2362_v47 = vld [vmem:[#allocation8 + $0x1e8] sm:$0xf0]  ;;  %v2910_v49 = vld [vmem:[#allocation8 + $0x44] sm:$0xf] }
  0x51   :  { %775 = vmatpush.bf16.msrb.mxu1 %v2201_v55  ;;  %v2229_v42 = vor.u32 %v2928_v39, %v2226_v40  ;;  %v2365_v48 = vor.u32 %v2962_v46, %v2362_v47  ;;  %v2154_v50 = vld [vmem:[#allocation8 + $0x48] sm:$0xf0]  ;;  %v2926_v51 = vld [vmem:[#allocation8 + $0xc4] sm:$0xf]  ;;  %v2944_v55 = vld [vmem:[#allocation8 + $0x154] sm:$0xf] }
  0x52   :  { %789 = vmatpush.bf16.msrb.mxu2 %v2265_v61  ;;  %v2157_v52 = vor.u32 %v2910_v49, %v2154_v50  ;;  %v2218_v53 = vld [vmem:[#allocation8 + $0xc8] sm:$0xf0]  ;;  %v2290_v56 = vld [vmem:[#allocation8 + $0x158] sm:$0xf0]  ;;  %v2960_v57 = vld [vmem:[#allocation8 + $0x1d4] sm:$0xf] }
  0x53   :  { %803 = vmatpush.bf16.msrb.mxu3 %v2329_v63  ;;  %v2221_v54 = vor.u32 %v2926_v51, %v2218_v53  ;;  %v2293_v58 = vor.u32 %v2944_v55, %v2290_v56  ;;  %v2354_v59 = vld [vmem:[#allocation8 + $0x1d8] sm:$0xf0]  ;;  %v2908_v61 = vld [vmem:[#allocation8 + $0x34] sm:$0xf]  ;;  %v2942_v3 = vld [vmem:[#allocation8 + $0x144] sm:$0xf] }
  0x54   :  { %762 = vmatpush.bf16.msrb.mxu0 %v2129_v62  ;;  %v2357_v60 = vor.u32 %v2960_v57, %v2354_v59  ;;  %v2146_v62 = vld [vmem:[#allocation8 + $0x38] sm:$0xf0]  ;;  %v2924_v63 = vld [vmem:[#allocation8 + $0xb4] sm:$0xf]  ;;  %v2282_v4 = vld [vmem:[#allocation8 + $0x148] sm:$0xf0] }
  0x55   :  { %776 = vmatpush.bf16.msrb.mxu1 %v2193_v0  ;;  %v2149_v0 = vor.u32 %v2908_v61, %v2146_v62  ;;  %v2210_v1 = vld [vmem:[#allocation8 + $0xb8] sm:$0xf0]  ;;  %v2346_v7 = vld [vmem:[#allocation8 + $0x1c8] sm:$0xf0]  ;;  %v2906_v9 = vld [vmem:[#allocation8 + $0x24] sm:$0xf] }
  0x56   :  { %790 = vmatpush.bf16.msrb.mxu2 %v2257_v15  ;;  %v2213_v2 = vor.u32 %v2924_v63, %v2210_v1  ;;  %v2922_v11 = vld [vmem:[#allocation8 + $0xa4] sm:$0xf]  ;;  %v2202_v13 = vld [vmem:[#allocation8 + $0xa8] sm:$0xf0]  ;;  %v2940_v15 = vld [vmem:[#allocation8 + $0x134] sm:$0xf] }
  0x57   :  { %804 = vmatpush.bf16.msrb.mxu3 %v2321_v18  ;;  %v2274_v16 = vld [vmem:[#allocation8 + $0x138] sm:$0xf0]  ;;  %v2956_v17 = vld [vmem:[#allocation8 + $0x1b4] sm:$0xf]  ;;  %v2938_v26 = vld [vmem:[#allocation8 + $0x124] sm:$0xf] }
  0x58   :  { %763 = vmatpush.bf16.msrb.mxu0 %v2121_v5  ;;  %v2958_v5 = vld [vmem:[#allocation8 + $0x1c4] sm:$0xf]  ;;  %v2277_v18 = vor.u32 %v2940_v15, %v2274_v16  ;;  %v2338_v19 = vld [vmem:[#allocation8 + $0x1b8] sm:$0xf0]  ;;  %v2920_v23 = vld [vmem:[#allocation8 + $0x94] sm:$0xf] }
  0x59   :  { %777 = vmatpush.bf16.msrb.mxu1 %v2185_v6  ;;  %v2285_v6 = vor.u32 %v2942_v3, %v2282_v4  ;;  %v2349_v8 = vor.u32 %v2958_v5, %v2346_v7  ;;  %v2341_v20 = vor.u32 %v2956_v17, %v2338_v19  ;;  %v2130_v22 = vld [vmem:[#allocation8 + $0x18] sm:$0xf0]  ;;  %v2266_v27 = vld [vmem:[#allocation8 + $0x128] sm:$0xf0]  ;;  %v2902_v32 = vld [vmem:[#allocation8 + $0x4] sm:$0xf] }
  0x5a   :  { %791 = vmatpush.bf16.msrb.mxu2 %v2249_v29  ;;  %v2269_v29 = vor.u32 %v2938_v26, %v2266_v27  ;;  %v2330_v31 = vld [vmem:[#allocation8 + $0x1a8] sm:$0xf0]  ;;  %v2918_v35 = vld [vmem:[#allocation8 + $0x84] sm:$0xf]  ;;  %v2936_v39 = vld [vmem:[#allocation8 + $0x114] sm:$0xf] }
  0x5b   :  { %805 = vmatpush.bf16.msrb.mxu3 %v2313_v30  ;;  %v2954_v30 = vld [vmem:[#allocation8 + $0x1a4] sm:$0xf]  ;;  %v2122_v34 = vld [vmem:[#allocation8 + $0x8] sm:$0xf0]  ;;  %v2258_v40 = vld [vmem:[#allocation8 + $0x118] sm:$0xf0] }
  0x5c   :  { %812 = vmatpush.bf16.msra.mxu0 %v2181_v10  ;;  %v2138_v10 = vld [vmem:[#allocation8 + $0x28] sm:$0xf0]  ;;  %v2261_v43 = vor.u32 %v2936_v39, %v2258_v40  ;;  %v2934_v47 = vld [vmem:[#allocation8 + $0x104] sm:$0xf]  ;;  %v2968_v26 = vld [vmem:[#allocation10 + $0x10] sm:$0xff]  ;;  %s3407_s13 = smov [#allocation18]  }
  0x5d   :  { %826 = vmatpush.bf16.msra.mxu1 %v2245_v14  ;;  %v2141_v12 = vor.u32 %v2906_v9, %v2138_v10  ;;  %v2205_v14 = vor.u32 %v2922_v11, %v2202_v13  ;;  %v2186_v36 = vld [vmem:[#allocation8 + $0x88] sm:$0xf0]  ;;  %v2950_v49 = vld [vmem:[#allocation8 + $0x184] sm:$0xf]  ;;  %v2980_v27 = vld [vmem:[#allocation10 + $0x70] sm:$0xff]  ;;  %s2026_s19 = sshll.u32 %s3407_s13, 4  ;;  %s2027_s19 = int_to_ptr.vmem [resolvable:$true] %s2026_s19 }
  0x5e   :  { %840 = vmatpush.bf16.msra.mxu2 %v2309_v33  ;;  %v2333_v33 = vor.u32 %v2954_v30, %v2330_v31  ;;  %v2189_v38 = vor.u32 %v2918_v35, %v2186_v36  ;;  %v2314_v53 = vld [vmem:[#allocation8 + $0x188] sm:$0xf0]  ;;  %v2966_v30 = vld [vmem:[#allocation10] sm:$0xff]  ;;  %s2028_s16 = sshll.u32 %s3561_s14, 4  ;;  %s2029_s16 = int_to_ptr.hbm [resolvable:$true] %s2028_s16 }
  0x5f   :  { %854 = vmatpush.bf16.msra.mxu3 %v2373_v37  ;;  %v2125_v37 = vor.u32 %v2902_v32, %v2122_v34  ;;  %v2317_v55 = vor.u32 %v2950_v49, %v2314_v53  ;;  %v2978_v31 = vld [vmem:[#allocation10 + $0x60] sm:$0xff]  ;;  %v2977_v32 = vld [vmem:[#allocation10 + $0x58] sm:$0xff]  ;;  %v2976_v34 = vld [vmem:[#allocation10 + $0x50] sm:$0xff] }
  0x60   :  { %813 = vmatpush.bf16.msra.mxu0 %v2173_v21  ;;  %v2904_v21 = vld [vmem:[#allocation8 + $0x14] sm:$0xf]  ;;  %v430_v35 = vld [vmem:[%s3551_s4] sm:$0x3]  ;;  %v2974_v40 = vld [vmem:[#allocation10 + $0x40] sm:$0xff] }
  0x61   :  { %827 = vmatpush.bf16.msra.mxu1 %v2237_v25  ;;  %v2133_v24 = vor.u32 %v2904_v21, %v2130_v22  ;;  %v2194_v25 = vld [vmem:[#allocation8 + $0x98] sm:$0xf0]  ;;  %v2972_v21 = vld [vmem:[#allocation10 + $0x30] sm:$0xff]  ;;  %v2971_v22 = vld [vmem:[#allocation10 + $0x28] sm:$0xff] }
  0x62   :  { %841 = vmatpush.bf16.msra.mxu2 %v2301_v45  ;;  %v2197_v28 = vor.u32 %v2920_v23, %v2194_v25  ;;  %v204_v45 = vld [vmem:[#allocation7] sm:$0xf]  ;;  %v2970_v23 = vld [vmem:[#allocation10 + $0x20] sm:$0xff] }
  0x63   :  { %855 = vmatpush.bf16.msra.mxu3 %v2365_v48  ;;  %v2250_v48 = vld [vmem:[#allocation8 + $0x108] sm:$0xf0]  ;;  %v206_v50 = vperm.slane %v204_v45, 0  ;;  %v208_v1 = vperm.slane %v204_v45, 2  ;;  %v209_v3 = vperm.slane %v204_v45, 3  ;;  %v2981_v25 = vld [vmem:[#allocation10 + $0x78] sm:$0xff] }
  0x64   :  { %814 = vmatpush.bf16.msra.mxu0 %v2165_v41  ;;  %v2952_v41 = vld [vmem:[#allocation8 + $0x194] sm:$0xf]  ;;  %v2498_v49 = vld [vmem:[#allocation11 + $0x78] sm:$0xf0] }
  0x65   :  { %828 = vmatpush.bf16.msra.mxu1 %v2229_v42  ;;  %v2322_v42 = vld [vmem:[#allocation8 + $0x198] sm:$0xf0] }
  0x66   :  { %842 = vmatpush.bf16.msra.mxu2 %v2293_v58  ;;  %v2325_v44 = vor.u32 %v2952_v41, %v2322_v42 }
  0x67   :  { %856 = vmatpush.bf16.msra.mxu3 %v2357_v60 }
  0x68   :  { %815 = vmatpush.bf16.msra.mxu0 %v2157_v52  ;;  %v2253_v52 = vor.u32 %v2934_v47, %v2250_v48 }
  0x69   :  { %829 = vmatpush.bf16.msra.mxu1 %v2221_v54  ;;  %v207_v54 = vperm.slane %v204_v45, 1  ;;  %v2997_v45 = vld [vmem:[#allocation11 + $0x74] sm:$0xf0] }
  0x6a   :  { %843 = vmatpush.bf16.msra.mxu2 %v2285_v6  ;;  %v2973_v6 = vld [vmem:[#allocation10 + $0x38] sm:$0xff] }
  0x6b   :  { %857 = vmatpush.bf16.msra.mxu3 %v2349_v8 }
  0x6c   :  { %816 = vmatpush.bf16.msra.mxu0 %v2149_v0 }
  0x6d   :  { %830 = vmatpush.bf16.msra.mxu1 %v2213_v2 }
  0x6e   :  { %844 = vmatpush.bf16.msra.mxu2 %v2277_v18 }
  0x6f   :  { %858 = vmatpush.bf16.msra.mxu3 %v2341_v20 }
  0x70   :  { %817 = vmatpush.bf16.msra.mxu0 %v2141_v12 }
  0x71   :  { %831 = vmatpush.bf16.msra.mxu1 %v2205_v14 }
  0x72   :  { %845 = vmatpush.bf16.msra.mxu2 %v2269_v29  ;;  %v2979_v29 = vld [vmem:[#allocation10 + $0x68] sm:$0xff] }
  0x73   :  { %859 = vmatpush.bf16.msra.mxu3 %v2333_v33 }
  0x74   :  { %818 = vmatpush.bf16.msra.mxu0 %v2133_v24  ;;  %v2969_v24 = vld [vmem:[#allocation10 + $0x18] sm:$0xff] }
  0x75   :  { %832 = vmatpush.bf16.msra.mxu1 %v2197_v28  ;;  %v2967_v28 = vld [vmem:[#allocation10 + $0x8] sm:$0xff] }
  0x76   :  { %846 = vmatpush.bf16.msra.mxu2 %v2261_v43 }
  0x77   :  { %860 = vmatpush.bf16.msra.mxu3 %v2325_v44  ;;  %v2496_v44 = vld [vmem:[#allocation11 + $0x70] sm:$0xf] }
  0x78   :  { %819 = vmatpush.bf16.msra.mxu0 %v2125_v37  ;;  %v2975_v37 = vld [vmem:[#allocation10 + $0x48] sm:$0xff]  ;;  %v2497_v48 = vor.u32 %v2997_v45, %v2496_v44  ;;  %v2986_v45 = vld [vmem:[#allocation11 + $0x24] sm:$0xf] }
  0x79   :  { %833 = vmatpush.bf16.msra.mxu1 %v2189_v38  ;;  %v432_v38 = vperm.slane %v430_v35, 0  ;;  %v2987_v44 = vld [vmem:[#allocation11 + $0x24] sm:$0xf0] }
  0x7a   :  { %847 = vmatpush.bf16.msra.mxu2 %v2253_v52 }
  0x7b   :  { %861 = vmatpush.bf16.msra.mxu3 %v2317_v55 }
  0xb8   :  { %v307_v46 = vpop.f32.mrf.mxu0 }
  0xb9   :  { %v321_v51 = vpop.f32.mrf.mxu1  ;;  %v308_v56 = vadd.f32 %v307_v46, %v206_v50  ;;  %v2996_v46 = vld [vmem:[#allocation11 + $0x74] sm:$0xf] }
  0xba   :  { %v322_v57 = vadd.f32 %v321_v51, %v207_v54  ;;  %v2501_v52 = vor.u32 %v2996_v46, %v2498_v49  ;;  %v2448_v49 = vld [vmem:[#allocation11 + $0x10] sm:$0xf] }
  0xbb   :  { %v354_v61 = vmax.f32 %v308_v56, 0.0 }
  0xbc   :  { %v355_v0 = vmax.f32 %v322_v57, 0.0 }
  0xc0   :  { %v335_v58 = vpop.f32.mrf.mxu2  ;;  %v309_v60 = vpop.f32.mrf.mxu0 }
  0xc1   :  { %v349_v59 = vpop.f32.mrf.mxu3  ;;  %v310_v62 = vadd.f32 %v309_v60, %v206_v50  ;;  %v323_v63 = vpop.f32.mrf.mxu1  ;;  %v336_v8 = vadd.f32 %v335_v58, %v208_v1  ;;  %v433_v60 = vperm.slane %v430_v35, 1  ;;  %v2474_v35 = vld [vmem:[#allocation11 + $0x48] sm:$0xf0] }
  0xc2   :  { %v324_v2 = vadd.f32 %v323_v63, %v207_v54  ;;  %v350_v10 = vadd.f32 %v349_v59, %v209_v3 }
  0xc3   :  { %v358_v4 = vmax.f32 %v310_v62, 0.0  ;;  %v356_v15 = vmax.f32 %v336_v8, 0.0 }
  0xc4   :  { %v359_v5 = vmax.f32 %v324_v2, 0.0  ;;  %v357_v17 = vmax.f32 %v350_v10, 0.0 }
  0xc5   :  { %v362_v7 = vpack.c.bf16 %v358_v4, %v354_v61 }
  0xc6   :  { %v363_v9 = vpack.c.bf16 %v359_v5, %v355_v0 }
  0xc7   :  { %764 = vmatmul.bf16.vlgmr.msrb.gmra.mxu0 %v362_v7 }
  0xc8   :  { %v337_v11 = vpop.f32.mrf.mxu2  ;;  %778 = vmatmul.bf16.vlgmr.msrb.gmra.mxu1 %v363_v9  ;;  %1006 = vmatpush.bf16.msrb.mxu0 %v2973_v6 }
  0xc9   :  { %v338_v12 = vadd.f32 %v337_v11, %v208_v1  ;;  %v351_v13 = vpop.f32.mrf.mxu3  ;;  %1020 = vmatpush.bf16.msrb.mxu1 %v2981_v25  ;;  %v2993_v25 = vld [vmem:[#allocation11 + $0x54] sm:$0xf0] }
  0xca   :  { %v352_v14 = vadd.f32 %v351_v13, %v209_v3 }
  0xcb   :  { %v360_v16 = vmax.f32 %v338_v12, 0.0 }
  0xcc   :  { %v361_v18 = vmax.f32 %v352_v14, 0.0  ;;  %1007 = vmatpush.bf16.msrb.mxu0 %v2972_v21  ;;  %v2994_v21 = vld [vmem:[#allocation11 + $0x64] sm:$0xf] }
  0xcd   :  { %v364_v19 = vpack.c.bf16 %v360_v16, %v356_v15  ;;  %1021 = vmatpush.bf16.msrb.mxu1 %v2980_v27  ;;  %v2992_v27 = vld [vmem:[#allocation11 + $0x54] sm:$0xf] }
  0xce   :  { %v365_v20 = vpack.c.bf16 %v361_v18, %v357_v17 }
  0xcf   :  { %792 = vmatmul.bf16.vlgmr.msrb.gmra.mxu2 %v364_v19 }
  0xd0   :  { %806 = vmatmul.bf16.vlgmr.msrb.gmra.mxu3 %v365_v20  ;;  %1008 = vmatpush.bf16.msrb.mxu0 %v2971_v22 }
  0xd1   :  { %1022 = vmatpush.bf16.msrb.mxu1 %v2979_v29  ;;  %1139 = vmatpush.bf16.msrb.mxu2 %v2497_v48 }
  0xd2   :  { %1153 = vmatpush.bf16.msrb.mxu3 %v2501_v52 }
  0xd4   :  { %1009 = vmatpush.bf16.msrb.mxu0 %v2970_v23  ;;  %v2490_v23 = vld [vmem:[#allocation11 + $0x68] sm:$0xf0] }
  0xd5   :  { %1023 = vmatpush.bf16.msrb.mxu1 %v2978_v31  ;;  %v2472_v31 = vld [vmem:[#allocation11 + $0x40] sm:$0xf] }
  0xd7   :  { %820 = vmatmul.bf16.vlgmr.msra.gmra.mxu0 %v362_v7 }
  0xd8   :  { %834 = vmatmul.bf16.vlgmr.msra.gmra.mxu1 %v363_v9  ;;  %1010 = vmatpush.bf16.msrb.mxu0 %v2969_v24  ;;  %v2480_v24 = vld [vmem:[#allocation11 + $0x50] sm:$0xf] }
  0xd9   :  { %1024 = vmatpush.bf16.msrb.mxu1 %v2977_v32  ;;  %v2481_v29 = vor.u32 %v2993_v25, %v2480_v24  ;;  %v2991_v32 = vld [vmem:[#allocation11 + $0x44] sm:$0xf0]  ;;  %v3052_v24 = vld [vmem:[#allocation14 + $0x1ac] sm:$0xf0] }
  0xda   :  { %v3018_v25 = vld [vmem:[#allocation14 + $0xa4] sm:$0xf] }
  0xdc   :  { %1011 = vmatpush.bf16.msrb.mxu0 %v2968_v26  ;;  %v2493_v26 = vor.u32 %v2994_v21, %v2490_v23  ;;  %v3020_v21 = vld [vmem:[#allocation14 + $0xac] sm:$0xf0]  ;;  %v2712_v23 = vld [vmem:[#allocation14 + $0x1a0] sm:$0xf] }
  0xdd   :  { %1025 = vmatpush.bf16.msrb.mxu1 %v2976_v34  ;;  %v2473_v34 = vor.u32 %v2991_v32, %v2472_v31  ;;  %v2568_v32 = vld [vmem:[#allocation14 + $0x80] sm:$0xf] }
  0xde   :  { %1154 = vmatpush.bf16.msrb.mxu3 %v2493_v26 }
  0xdf   :  { %848 = vmatmul.bf16.vlgmr.msra.gmra.mxu2 %v364_v19  ;;  %v2488_v19 = vld [vmem:[#allocation11 + $0x60] sm:$0xf] }
  0xe0   :  { %862 = vmatmul.bf16.vlgmr.msra.gmra.mxu3 %v365_v20  ;;  %1012 = vmatpush.bf16.msrb.mxu0 %v2967_v28  ;;  %v2995_v20 = vld [vmem:[#allocation11 + $0x64] sm:$0xf0]  ;;  %v2482_v28 = vld [vmem:[#allocation11 + $0x58] sm:$0xf0] }
  0xe1   :  { %1026 = vmatpush.bf16.msrb.mxu1 %v2975_v37  ;;  %v2489_v22 = vor.u32 %v2995_v20, %v2488_v19  ;;  %v2989_v37 = vld [vmem:[#allocation11 + $0x34] sm:$0xf0]  ;;  %v2584_v20 = vld [vmem:[#allocation14 + $0xa0] sm:$0xf] }
  0xe2   :  { %v2730_v19 = vld [vmem:[#allocation14 + $0x1d0] sm:$0xf0]  ;;  %v2585_v26 = vor.u32 %v3020_v21, %v2584_v20 }
  0xe3   :  { %1140 = vmatpush.bf16.msrb.mxu2 %v2489_v22 }
  0xe4   :  { %1013 = vmatpush.bf16.msrb.mxu0 %v2966_v30  ;;  %v2485_v30 = vor.u32 %v2992_v27, %v2482_v28  ;;  %v2586_v27 = vld [vmem:[#allocation14 + $0xb0] sm:$0xf0]  ;;  %v3050_v28 = vld [vmem:[#allocation14 + $0x1a4] sm:$0xf] }
  0xe5   :  { %1027 = vmatpush.bf16.msrb.mxu1 %v2974_v40  ;;  %v2466_v40 = vld [vmem:[#allocation11 + $0x38] sm:$0xf0]  ;;  %v2589_v31 = vor.u32 %v3018_v25, %v2586_v27  ;;  %v2632_v25 = vld [vmem:[#allocation14 + $0x100] sm:$0xf]  ;;  %v3032_v27 = vld [vmem:[#allocation14 + $0x10c] sm:$0xf0] }
  0xe6   :  { %1155 = vmatpush.bf16.msrb.mxu3 %v2485_v30  ;;  %v2713_v30 = vor.u32 %v3052_v24, %v2712_v23  ;;  %v3000_v23 = vld [vmem:[#allocation14 + $0xc] sm:$0xf0] }
  0xe7   :  { %1141 = vmatpush.bf16.msrb.mxu2 %v2481_v29  ;;  %v2714_v29 = vld [vmem:[#allocation14 + $0x1b0] sm:$0xf0] }
  0xeb   :  { %1142 = vmatpush.bf16.msrb.mxu2 %v2473_v34  ;;  %v2696_v34 = vld [vmem:[#allocation14 + $0x180] sm:$0xf] }
 0x144   :  { %v765_v33 = vpop.f32.mrf.mxu0 }
 0x145   :  { %v779_v36 = vpop.f32.mrf.mxu1  ;;  %v766_v41 = vadd.f32 %v765_v33, %v432_v38  ;;  %v2990_v33 = vld [vmem:[#allocation11 + $0x44] sm:$0xf] }
 0x147   :  { %v780_v50 = vadd.f32 %v779_v36, %v766_v41  ;;  %v2464_v36 = vld [vmem:[#allocation11 + $0x30] sm:$0xf] }
 0x148   :  { %v2465_v41 = vor.u32 %v2989_v37, %v2464_v36  ;;  %v3048_v36 = vld [vmem:[#allocation14 + $0x18c] sm:$0xf0]  ;;  %v3014_v37 = vld [vmem:[#allocation14 + $0x84] sm:$0xf] }
 0x14a   :  { %1143 = vmatpush.bf16.msrb.mxu2 %v2465_v41 }
 0x14c   :  { %v767_v39 = vpop.f32.mrf.mxu0 }
 0x14d   :  { %v781_v47 = vpop.f32.mrf.mxu1  ;;  %v768_v51 = vadd.f32 %v767_v39, %v432_v38  ;;  %v2477_v38 = vor.u32 %v2990_v33, %v2474_v35  ;;  %v2988_v39 = vld [vmem:[#allocation11 + $0x34] sm:$0xf]  ;;  %v2717_v35 = vor.u32 %v3050_v28, %v2714_v29  ;;  %v2998_v28 = vld [vmem:[#allocation14 + $0x4] sm:$0xf] }
 0x14e   :  { %v3016_v33 = vld [vmem:[#allocation14 + $0x8c] sm:$0xf0]  ;;  %v2506_v29 = vld [vmem:[#allocation14 + $0x10] sm:$0xf0] }
 0x14f   :  { %v782_v55 = vadd.f32 %v781_v47, %v768_v51  ;;  %1156 = vmatpush.bf16.msrb.mxu3 %v2477_v38  ;;  %v2458_v47 = vld [vmem:[#allocation11 + $0x28] sm:$0xf0]  ;;  %v2984_v51 = vld [vmem:[#allocation11 + $0x14] sm:$0xf]  ;;  %v2569_v41 = vor.u32 %v3016_v33, %v2568_v32  ;;  %v3030_v32 = vld [vmem:[#allocation14 + $0x104] sm:$0xf] }
 0x150   :  { %v2461_v48 = vor.u32 %v2986_v45, %v2458_v47  ;;  %v2570_v38 = vld [vmem:[#allocation14 + $0x90] sm:$0xf0]  ;;  %v3012_v45 = vld [vmem:[#allocation14 + $0x6c] sm:$0xf0] }
 0x151   :  { %v2634_v33 = vld [vmem:[#allocation14 + $0x110] sm:$0xf0] }
 0x152   :  { %v793_v42 = vpop.f32.mrf.mxu2 }
 0x153   :  { %v807_v43 = vpop.f32.mrf.mxu3  ;;  %v794_v53 = vadd.f32 %v793_v42, %v780_v50  ;;  %v2469_v42 = vor.u32 %v2988_v39, %v2466_v40  ;;  %v2985_v50 = vld [vmem:[#allocation11 + $0x14] sm:$0xf0]  ;;  %v3046_v39 = vld [vmem:[#allocation14 + $0x184] sm:$0xf] }
 0x154   :  { %v821_v54 = vpop.f32.mrf.mxu0  ;;  %v2449_v52 = vor.u32 %v2985_v50, %v2448_v49  ;;  %v2698_v40 = vld [vmem:[#allocation14 + $0x190] sm:$0xf0]  ;;  %v3044_v49 = vld [vmem:[#allocation14 + $0x16c] sm:$0xf0]  ;;  %v3010_v50 = vld [vmem:[#allocation14 + $0x64] sm:$0xf] }
 0x155   :  { %v808_v57 = vadd.f32 %v807_v43, %v794_v53  ;;  %v835_v62 = vpop.f32.mrf.mxu1  ;;  %v822_v1 = vadd.f32 %v821_v54, %v433_v60  ;;  %1157 = vmatpush.bf16.msrb.mxu3 %v2469_v42  ;;  %v2456_v43 = vld [vmem:[#allocation11 + $0x20] sm:$0xf]  ;;  %v2450_v53 = vld [vmem:[#allocation11 + $0x18] sm:$0xf0]  ;;  %v2697_v42 = vor.u32 %v3048_v36, %v2696_v34  ;;  %v2509_v36 = vor.u32 %v2998_v28, %v2506_v29  ;;  %v3011_v28 = vld [vmem:[#allocation14 + $0x6c] sm:$0xf] }
 0x156   :  { %v2457_v46 = vor.u32 %v2987_v44, %v2456_v43  ;;  %v2453_v54 = vor.u32 %v2984_v51, %v2450_v53  ;;  %v2573_v43 = vor.u32 %v3014_v37, %v2570_v38  ;;  %v2552_v44 = vld [vmem:[#allocation14 + $0x60] sm:$0xf]  ;;  %v2554_v51 = vld [vmem:[#allocation14 + $0x70] sm:$0xf0]  ;;  %v3042_v53 = vld [vmem:[#allocation14 + $0x164] sm:$0xf]  ;;  %v2637_v38 = vor.u32 %v3030_v32, %v2634_v33 }
 0x157   :  { %v868_v63 = vmax.f32 %v808_v57, 0.0  ;;  %v836_v6 = vadd.f32 %v835_v62, %v822_v1  ;;  %v2982_v57 = vld [vmem:[#allocation11 + $0x4] sm:$0xf]  ;;  %v3028_v62 = vld [vmem:[#allocation14 + $0xec] sm:$0xf0] }
 0x158   :  { %1144 = vmatpush.bf16.msrb.mxu2 %v2457_v46  ;;  %v3060_v1 = vld [vmem:[#allocation14 + $0x1ec] sm:$0xf0]  ;;  %v2680_v46 = vld [vmem:[#allocation14 + $0x160] sm:$0xf]  ;;  %v2562_v29 = vld [vmem:[#allocation14 + $0x78] sm:$0xf0] }
 0x159   :  { %1158 = vmatpush.bf16.msrb.mxu3 %v2461_v48  ;;  %v2701_v48 = vor.u32 %v3046_v39, %v2698_v40  ;;  %v2624_v39 = vld [vmem:[#allocation14 + $0xe8] sm:$0xf]  ;;  %v3029_v40 = vld [vmem:[#allocation14 + $0xf4] sm:$0xf0]  ;;  %v3043_v32 = vld [vmem:[#allocation14 + $0x16c] sm:$0xf] }
 0x15a   :  { %v795_v56 = vpop.f32.mrf.mxu2  ;;  %v2690_v33 = vld [vmem:[#allocation14 + $0x178] sm:$0xf0] }
 0x15b   :  { %v796_v58 = vadd.f32 %v795_v56, %v782_v55  ;;  %v809_v59 = vpop.f32.mrf.mxu3  ;;  %v2440_v55 = vld [vmem:[#allocation11] sm:$0xf]  ;;  %v2983_v56 = vld [vmem:[#allocation11 + $0x4] sm:$0xf0] }
 0x15c   :  { %v823_v3 = vpop.f32.mrf.mxu0  ;;  %1145 = vmatpush.bf16.msrb.mxu2 %v2449_v52  ;;  %v3111_v52 = vld [vmem:[%s3553_s6] ss:$0 sm:$0xff] }
 0x15d   :  { %v810_v61 = vadd.f32 %v809_v59, %v796_v58  ;;  %v824_v7 = vadd.f32 %v823_v3, %v433_v60  ;;  %v837_v9 = vpop.f32.mrf.mxu1  ;;  %1159 = vmatpush.bf16.msrb.mxu3 %v2453_v54  ;;  %v2441_v58 = vor.u32 %v2983_v56, %v2440_v55  ;;  %v2442_v59 = vld [vmem:[#allocation11 + $0x8] sm:$0xf0]  ;;  %v2618_v3 = vld [vmem:[#allocation14 + $0xf0] sm:$0xf0]  ;;  %v2553_v55 = vor.u32 %v3012_v45, %v2552_v44  ;;  %v2626_v45 = vld [vmem:[#allocation14 + $0xf8] sm:$0xf0] }
 0x15e   :  { %v2445_v60 = vor.u32 %v2982_v57, %v2442_v59  ;;  %v2682_v54 = vld [vmem:[#allocation14 + $0x170] sm:$0xf0]  ;;  %v2681_v56 = vor.u32 %v3044_v49, %v2680_v46  ;;  %v2557_v57 = vor.u32 %v3010_v50, %v2554_v51  ;;  %v3008_v59 = vld [vmem:[#allocation14 + $0x4c] sm:$0xf0]  ;;  %v3027_v44 = vld [vmem:[#allocation14 + $0xec] sm:$0xf] }
 0x15f   :  { %v870_v0 = vmax.f32 %v810_v61, 0.0  ;;  %v838_v10 = vadd.f32 %v837_v9, %v824_v7  ;;  %v2616_v61 = vld [vmem:[#allocation14 + $0xe0] sm:$0xf]  ;;  %v2746_v7 = vld [vmem:[#allocation14 + $0x1f0] sm:$0xf0] }
 0x160   :  { %1146 = vmatpush.bf16.msrb.mxu2 %v2441_v58  ;;  %v2536_v58 = vld [vmem:[#allocation14 + $0x40] sm:$0xf]  ;;  %v2754_v49 = vld [vmem:[#allocation14 + $0x1f8] sm:$0xf0]  ;;  %v2608_v51 = vld [vmem:[#allocation14 + $0xc8] sm:$0xf] }
 0x161   :  { %v872_v2 = vpack.c.bf16 %v870_v0, %v868_v63  ;;  %1160 = vmatpush.bf16.msrb.mxu3 %v2445_v60  ;;  %v2744_v63 = vld [vmem:[#allocation14 + $0x1e0] sm:$0xf]  ;;  %v2617_v0 = vor.u32 %v3028_v62, %v2616_v61  ;;  %v2685_v61 = vor.u32 %v3042_v53, %v2682_v54  ;;  %v3040_v62 = vld [vmem:[#allocation14 + $0x14c] sm:$0xf0]  ;;  %v2736_v53 = vld [vmem:[#allocation14 + $0x1c8] sm:$0xf] }
 0x162   :  { %v849_v4 = vpop.f32.mrf.mxu2  ;;  %v2664_v60 = vld [vmem:[#allocation14 + $0x140] sm:$0xf] }
 0x163   :  { %v863_v5 = vpop.f32.mrf.mxu3  ;;  %1014 = vmatmul.bf16.vlgmr.msrb.gmra.mxu0 %v872_v2  ;;  %v850_v8 = vadd.f32 %v849_v4, %v836_v6  ;;  %v3026_v2 = vld [vmem:[#allocation14 + $0xe4] sm:$0xf]  ;;  %v2745_v4 = vor.u32 %v3060_v1, %v2744_v63 }
 0x164   :  { %v3058_v6 = vld [vmem:[#allocation14 + $0x1e4] sm:$0xf]  ;;  %1567 = vmatpush.bf16.msra.mxu0 %v2617_v0  ;;  %v2538_v0 = vld [vmem:[#allocation14 + $0x50] sm:$0xf0] }
 0x165   :  { %v864_v12 = vadd.f32 %v863_v5, %v850_v8  ;;  %v2621_v5 = vor.u32 %v3026_v2, %v2618_v3  ;;  %v2600_v8 = vld [vmem:[#allocation14 + $0xc0] sm:$0xf]  ;;  %v2749_v9 = vor.u32 %v3058_v6, %v2746_v7  ;;  %1581 = vmatpush.bf16.msra.mxu1 %v2745_v4  ;;  %v3006_v63 = vld [vmem:[#allocation14 + $0x44] sm:$0xf]  ;;  %v2666_v3 = vld [vmem:[#allocation14 + $0x150] sm:$0xf0]  ;;  %v2665_v7 = vor.u32 %v3040_v62, %v2664_v60 }
 0x166   :  { %v3038_v2 = vld [vmem:[#allocation14 + $0x144] sm:$0xf]  ;;  %v3055_v60 = vld [vmem:[#allocation14 + $0x1cc] sm:$0xf] }
 0x167   :  { %v869_v16 = vmax.f32 %v864_v12, 0.0  ;;  %v3056_v12 = vld [vmem:[#allocation14 + $0x1cc] sm:$0xf0]  ;;  %1595 = vmatpush.bf16.msra.mxu2 %v2621_v5  ;;  %1609 = vmatpush.bf16.msra.mxu3 %v2749_v9  ;;  %v2537_v5 = vor.u32 %v3008_v59, %v2536_v58  ;;  %v2520_v9 = vld [vmem:[#allocation14 + $0x20] sm:$0xf] }
 0x16a   :  { %v851_v11 = vpop.f32.mrf.mxu2 }
 0x16b   :  { %v852_v13 = vadd.f32 %v851_v11, %v838_v10  ;;  %v865_v14 = vpop.f32.mrf.mxu3  ;;  %v3024_v10 = vld [vmem:[#allocation14 + $0xcc] sm:$0xf0]  ;;  %v2728_v11 = vld [vmem:[#allocation14 + $0x1c0] sm:$0xf] }
 0x16d   :  { %v866_v15 = vadd.f32 %v865_v14, %v852_v13  ;;  %v2601_v13 = vor.u32 %v3024_v10, %v2600_v8  ;;  %v2729_v14 = vor.u32 %v3056_v12, %v2728_v11  ;;  %v2541_v8 = vor.u32 %v3006_v63, %v2538_v0  ;;  %v3004_v10 = vld [vmem:[#allocation14 + $0x2c] sm:$0xf0]  ;;  %v2648_v11 = vld [vmem:[#allocation14 + $0x120] sm:$0xf]  ;;  %v2592_v63 = vld [vmem:[#allocation14 + $0xa8] sm:$0xf] }
 0x16e   :  { %v2669_v12 = vor.u32 %v3038_v2, %v2666_v3  ;;  %v3021_v0 = vld [vmem:[#allocation14 + $0xb4] sm:$0xf0] }
 0x16f   :  { %v871_v17 = vmax.f32 %v866_v15, 0.0  ;;  %v3022_v15 = vld [vmem:[#allocation14 + $0xc4] sm:$0xf]  ;;  %1568 = vmatpush.bf16.msra.mxu0 %v2601_v13  ;;  %1582 = vmatpush.bf16.msra.mxu1 %v2729_v14  ;;  %v3036_v13 = vld [vmem:[#allocation14 + $0x12c] sm:$0xf0]  ;;  %v2593_v2 = vor.u32 %v3021_v0, %v2592_v63 }
 0x170   :  { %v3002_v14 = vld [vmem:[#allocation14 + $0x24] sm:$0xf]  ;;  %v2649_v20 = vor.u32 %v3036_v13, %v2648_v11  ;;  %v3053_v3 = vld [vmem:[#allocation14 + $0x1b4] sm:$0xf0]  ;;  %v2576_v11 = vld [vmem:[#allocation14 + $0x88] sm:$0xf] }
 0x171   :  { %v873_v18 = vpack.c.bf16 %v871_v17, %v869_v16  ;;  %v2602_v16 = vld [vmem:[#allocation14 + $0xd0] sm:$0xf0]  ;;  %v3054_v17 = vld [vmem:[#allocation14 + $0x1c4] sm:$0xf]  ;;  %v2704_v13 = vld [vmem:[#allocation14 + $0x188] sm:$0xf] }
 0x172   :  { %v2733_v22 = vor.u32 %v3054_v17, %v2730_v19  ;;  %v2650_v17 = vld [vmem:[#allocation14 + $0x130] sm:$0xf0]  ;;  %v2521_v19 = vor.u32 %v3004_v10, %v2520_v9  ;;  %v2722_v9 = vld [vmem:[#allocation14 + $0x1b8] sm:$0xf0]  ;;  %v2999_v63 = vld [vmem:[#allocation14 + $0xc] sm:$0xf] }
 0x173   :  { %1028 = vmatmul.bf16.vlgmr.msrb.gmra.mxu1 %v873_v18  ;;  %v2605_v18 = vor.u32 %v3022_v15, %v2602_v16  ;;  %1569 = vmatpush.bf16.msra.mxu0 %v2585_v26  ;;  %v2522_v15 = vld [vmem:[#allocation14 + $0x30] sm:$0xf0]  ;;  %v3034_v16 = vld [vmem:[#allocation14 + $0x124] sm:$0xf]  ;;  %v2514_v0 = vld [vmem:[#allocation14 + $0x18] sm:$0xf0] }
 0x174   :  { %1610 = vmatpush.bf16.msra.mxu3 %v2733_v22  ;;  %1583 = vmatpush.bf16.msra.mxu1 %v2713_v30  ;;  %v2525_v21 = vor.u32 %v3002_v14, %v2522_v15  ;;  %v2504_v22 = vld [vmem:[#allocation14] sm:$0xf]  ;;  %v2653_v24 = vor.u32 %v3034_v16, %v2650_v17  ;;  %v3049_v15 = vld [vmem:[#allocation14 + $0x194] sm:$0xf0]  ;;  %v3015_v16 = vld [vmem:[#allocation14 + $0x8c] sm:$0xf] }
 0x175   :  { %1596 = vmatpush.bf16.msra.mxu2 %v2605_v18  ;;  %v2578_v17 = vld [vmem:[#allocation14 + $0x98] sm:$0xf0] }
 0x177   :  { %1570 = vmatpush.bf16.msra.mxu0 %v2569_v41  ;;  %v2752_v41 = vld [vmem:[#allocation14 + $0x1e8] sm:$0xf] }
 0x178   :  { %1611 = vmatpush.bf16.msra.mxu3 %v2717_v35  ;;  %1584 = vmatpush.bf16.msra.mxu1 %v2697_v42  ;;  %v2633_v35 = vor.u32 %v3032_v27, %v2632_v25  ;;  %v2625_v42 = vor.u32 %v3029_v40, %v2624_v39  ;;  %v2688_v25 = vld [vmem:[#allocation14 + $0x168] sm:$0xf]  ;;  %v3045_v27 = vld [vmem:[#allocation14 + $0x174] sm:$0xf0] }
 0x179   :  { %1597 = vmatpush.bf16.msra.mxu2 %v2589_v31  ;;  %v2505_v31 = vor.u32 %v3000_v23, %v2504_v22  ;;  %v2560_v23 = vld [vmem:[#allocation14 + $0x68] sm:$0xf] }
 0x17b   :  { %1571 = vmatpush.bf16.msra.mxu0 %v2553_v55  ;;  %v3057_v55 = vld [vmem:[#allocation14 + $0x1d4] sm:$0xf0] }
 0x17c   :  { %1612 = vmatpush.bf16.msra.mxu3 %v2701_v48  ;;  %1585 = vmatpush.bf16.msra.mxu1 %v2681_v56  ;;  %v3059_v48 = vld [vmem:[#allocation14 + $0x1ec] sm:$0xf]  ;;  %v2737_v58 = vor.u32 %v3057_v55, %v2736_v53  ;;  %v2530_v53 = vld [vmem:[#allocation14 + $0x38] sm:$0xf0] }
 0x17d   :  { %1598 = vmatpush.bf16.msra.mxu2 %v2573_v43  ;;  %v3061_v43 = vld [vmem:[#allocation14 + $0x1f4] sm:$0xf0]  ;;  %v2757_v50 = vor.u32 %v3059_v48, %v2754_v49  ;;  %v3023_v56 = vld [vmem:[#allocation14 + $0xcc] sm:$0xf]  ;;  %v2656_v49 = vld [vmem:[#allocation14 + $0x128] sm:$0xf] }
 0x17e   :  { %v2753_v46 = vor.u32 %v3061_v43, %v2752_v41  ;;  %v3007_v41 = vld [vmem:[#allocation14 + $0x4c] sm:$0xf]  ;;  %v2658_v55 = vld [vmem:[#allocation14 + $0x138] sm:$0xf0] }
 0x17f   :  { %1572 = vmatpush.bf16.msra.mxu0 %v2537_v5  ;;  %v2594_v5 = vld [vmem:[#allocation14 + $0xb8] sm:$0xf0]  ;;  %v3039_v43 = vld [vmem:[#allocation14 + $0x14c] sm:$0xf] }
 0x180   :  { %1613 = vmatpush.bf16.msra.mxu3 %v2685_v61  ;;  %1586 = vmatpush.bf16.msra.mxu1 %v2665_v7  ;;  %v2738_v61 = vld [vmem:[#allocation14 + $0x1d8] sm:$0xf0] }
 0x181   :  { %1599 = vmatpush.bf16.msra.mxu2 %v2557_v57  ;;  %v2610_v57 = vld [vmem:[#allocation14 + $0xd8] sm:$0xf0]  ;;  %v2741_v62 = vor.u32 %v3055_v60, %v2738_v61  ;;  %v2640_v60 = vld [vmem:[#allocation14 + $0x108] sm:$0xf] }
 0x182   :  { %v2613_v59 = vor.u32 %v3023_v56, %v2610_v57 }
 0x183   :  { %1573 = vmatpush.bf16.msra.mxu0 %v2521_v19  ;;  %v2581_v19 = vor.u32 %v3015_v16, %v2578_v17 }
 0x184   :  { %1614 = vmatpush.bf16.msra.mxu3 %v2669_v12  ;;  %1587 = vmatpush.bf16.msra.mxu1 %v2649_v20  ;;  %v3017_v12 = vld [vmem:[#allocation14 + $0x94] sm:$0xf0]  ;;  %v3047_v20 = vld [vmem:[#allocation14 + $0x18c] sm:$0xf] }
 0x185   :  { %1600 = vmatpush.bf16.msra.mxu2 %v2541_v8  ;;  %v3051_v8 = vld [vmem:[#allocation14 + $0x1ac] sm:$0xf]  ;;  %v2577_v14 = vor.u32 %v3017_v12, %v2576_v11 }
 0x186   :  { %v2725_v10 = vor.u32 %v3051_v8, %v2722_v9 }
 0x187   :  { %1574 = vmatpush.bf16.msra.mxu0 %v2505_v31  ;;  %v2565_v31 = vor.u32 %v3011_v28, %v2562_v29  ;;  %v3067_v28 = vld [vmem:[#allocation16 + $0x28] sm:$0xff]  ;;  %v3066_v29 = vld [vmem:[#allocation16 + $0x20] sm:$0xff] }
 0x188   :  { %1615 = vmatpush.bf16.msra.mxu3 %v2653_v24  ;;  %1588 = vmatpush.bf16.msra.mxu1 %v2633_v35  ;;  %v3013_v24 = vld [vmem:[#allocation14 + $0x74] sm:$0xf0]  ;;  %v2693_v35 = vor.u32 %v3043_v32, %v2690_v33  ;;  %v3074_v33 = vld [vmem:[#allocation16 + $0x60] sm:$0xff] }
 0x189   :  { %1601 = vmatpush.bf16.msra.mxu2 %v2525_v21  ;;  %v2706_v21 = vld [vmem:[#allocation14 + $0x198] sm:$0xf0] }
 0x18a   :  { %v2709_v22 = vor.u32 %v3047_v20, %v2706_v21  ;;  %v3085_v32 = vld [vmem:[#allocation16 + $0xb8] sm:$0xff] }
 0x18b   :  { %1623 = vmatpush.bf16.msrb.mxu0 %v2625_v42  ;;  %v2546_v42 = vld [vmem:[#allocation14 + $0x58] sm:$0xf0] }
 0x18c   :  { %1616 = vmatpush.bf16.msra.mxu3 %v2637_v38  ;;  %1637 = vmatpush.bf16.msrb.mxu1 %v2753_v46  ;;  %v3041_v38 = vld [vmem:[#allocation14 + $0x154] sm:$0xf0]  ;;  %v2528_v46 = vld [vmem:[#allocation14 + $0x28] sm:$0xf] }
 0x18d   :  { %1602 = vmatpush.bf16.msra.mxu2 %v2509_v36  ;;  %v3009_v36 = vld [vmem:[#allocation14 + $0x54] sm:$0xf0] }
 0x190   :  { %1638 = vmatpush.bf16.msrb.mxu1 %v2737_v58  ;;  %v2512_v58 = vld [vmem:[#allocation14 + $0x8] sm:$0xf] }
 0x1e0   :  { %v1015_v47 = vpop.f32.mrf.mxu0 }
 0x1e1   :  { %v1016_v1 = vadd.f32 %v3111_v52, %v1015_v47  ;;  %v2629_v47 = vor.u32 %v3027_v44, %v2626_v45  ;;  %v2549_v44 = vor.u32 %v3007_v41, %v2546_v42  ;;  %v2674_v45 = vld [vmem:[#allocation14 + $0x158] sm:$0xf0]  ;;  %v3092_v41 = vld [vmem:[#allocation16 + $0xf0] sm:$0xff]  ;;  %v3062_v42 = vld [vmem:[#allocation16] sm:$0xff] }
 0x1e2   :  { %v2677_v48 = vor.u32 %v3039_v43, %v2674_v45  ;;  %v3082_v43 = vld [vmem:[#allocation16 + $0xa0] sm:$0xff]  ;;  %v3091_v45 = vld [vmem:[#allocation16 + $0xe8] sm:$0xff] }
 0x1e8   :  { %v1017_v18 = vpop.f32.mrf.mxu0 }
 0x1e9   :  { %v1018_v26 = vadd.f32 %v3111_v52, %v1017_v18  ;;  %v3025_v52 = vld [vmem:[#allocation14 + $0xd4] sm:$0xf0]  ;;  %v2705_v18 = vor.u32 %v3049_v15, %v2704_v13 }
 0x1ea   :  { %v2609_v54 = vor.u32 %v3025_v52, %v2608_v51  ;;  %v3003_v51 = vld [vmem:[#allocation14 + $0x2c] sm:$0xf] }
 0x1eb   :  { %v2533_v57 = vor.u32 %v3003_v51, %v2530_v53  ;;  %v3079_v51 = vld [vmem:[#allocation16 + $0x88] sm:$0xff]  ;;  %v3078_v53 = vld [vmem:[#allocation16 + $0x80] sm:$0xff] }
 0x1ec   :  { %1624 = vmatpush.bf16.msrb.mxu0 %v2609_v54  ;;  %v3035_v54 = vld [vmem:[#allocation14 + $0x12c] sm:$0xf] }
 0x1ed   :  { %v2661_v61 = vor.u32 %v3035_v54, %v2658_v55  ;;  %v1237_v54 = vld [vmem:[%s3557_s10] sm:$0xf]  ;;  %s3406_s10 = smov [#allocation17]  }
 0x1ee   :  { %v3087_v55 = vld [vmem:[#allocation16 + $0xc8] sm:$0xff]  ;;  %s2013_s27 = sshll.u32 %s3406_s10, 4  ;;  %s2014_s27 = int_to_ptr.vmem [resolvable:$true] %s2013_s27 }
 0x1f0   :  { %v1029_v4 = vpop.f32.mrf.mxu1  ;;  %1625 = vmatpush.bf16.msrb.mxu0 %v2593_v2  ;;  %v2642_v2 = vld [vmem:[#allocation14 + $0x118] sm:$0xf0] }
 0x1f1   :  { %v1030_v6 = vadd.f32 %v1029_v4, %v1016_v1  ;;  %v2720_v1 = vld [vmem:[#allocation14 + $0x1a8] sm:$0xf]  ;;  %v3019_v4 = vld [vmem:[#allocation14 + $0xac] sm:$0xf] }
 0x1f2   :  { %v2597_v7 = vor.u32 %v3019_v4, %v2594_v5  ;;  %v2517_v5 = vor.u32 %v2999_v63, %v2514_v0  ;;  %v1240_v63 = vperm.slane %v1237_v54, 1 }
 0x1f3   :  { %1034 = vst [vmem:[#allocation17] sm:$0xff] %v1030_v6 }
 0x1f4   :  { %1626 = vmatpush.bf16.msrb.mxu0 %v2577_v14 }
 0x1f8   :  { %v1031_v30 = vpop.f32.mrf.mxu1 }
 0x1f9   :  { %v1032_v34 = vadd.f32 %v1031_v30, %v1018_v26  ;;  %v2561_v26 = vor.u32 %v3013_v24, %v2560_v23  ;;  %v2689_v30 = vor.u32 %v3045_v27, %v2688_v25  ;;  %v3069_v24 = vld [vmem:[#allocation16 + $0x38] sm:$0xff]  ;;  %v3076_v27 = vld [vmem:[#allocation16 + $0x70] sm:$0xff] }
 0x1fa   :  { %v3077_v25 = vld [vmem:[#allocation16 + $0x78] sm:$0xff] }
 0x1fb   :  { %1035 = vst [vmem:[#allocation17 + $0x8] sm:$0xff] %v1032_v34  ;;  %v1036_v37 = vpack.c.bf16 %v1032_v34, %v1030_v6  ;;  %v2721_v6 = vor.u32 %v3053_v3, %v2720_v1  ;;  %v2544_v34 = vld [vmem:[#allocation14 + $0x48] sm:$0xf]  ;;  %1627 = vmatpush.bf16.msrb.mxu0 %v2561_v26  ;;  %v3031_v1 = vld [vmem:[#allocation14 + $0x10c] sm:$0xf]  ;;  %v3068_v26 = vld [vmem:[#allocation16 + $0x30] sm:$0xff] }
 0x1fc   :  { %v2545_v39 = vor.u32 %v3009_v36, %v2544_v34  ;;  %v3064_v34 = vld [vmem:[#allocation16 + $0x10] sm:$0xff]  ;;  %v3073_v36 = vld [vmem:[#allocation16 + $0x58] sm:$0xff]  ;;  %2021 = dma.vmem_to_hbm [thread:$0]  %s2014_s27, 256, %s2016_s3, [#allocation4], %s3395_s1, %s3395_s1, %s3396_s28  }
 0x1fd   :  { %1147 = vmatmul.bf16.vlgmr.msrb.gmra.mxu2 %v1036_v37  ;;  %1161 = vmatmul.bf16.vlgmr.msrb.gmra.mxu3 %v1036_v37  ;;  %v2672_v37 = vld [vmem:[#allocation14 + $0x148] sm:$0xf] }
 0x1fe   :  { %1651 = vmatpush.bf16.msrb.mxu2 %v2629_v47  ;;  %1665 = vmatpush.bf16.msrb.mxu3 %v2757_v50  ;;  %v2673_v40 = vor.u32 %v3041_v38, %v2672_v37  ;;  %v3005_v47 = vld [vmem:[#allocation14 + $0x34] sm:$0xf0]  ;;  %v3063_v38 = vld [vmem:[#allocation16 + $0x8] sm:$0xff] }
 0x1ff   :  { %1639 = vmatpush.bf16.msrb.mxu1 %v2721_v6  ;;  %v3037_v50 = vld [vmem:[#allocation14 + $0x134] sm:$0xf0]  ;;  %1628 = vmatpush.bf16.msrb.mxu0 %v2545_v39  ;;  %v2529_v52 = vor.u32 %v3005_v47, %v2528_v46  ;;  %v2645_v6 = vor.u32 %v3031_v1, %v2642_v2  ;;  %v3083_v39 = vld [vmem:[#allocation16 + $0xa8] sm:$0xff]  ;;  %v3070_v47 = vld [vmem:[#allocation16 + $0x40] sm:$0xff] }
 0x200   :  { %v2657_v56 = vor.u32 %v3037_v50, %v2656_v49  ;;  %v3093_v37 = vld [vmem:[#allocation16 + $0xf8] sm:$0xff]  ;;  %v3080_v49 = vld [vmem:[#allocation16 + $0x90] sm:$0xff] }
 0x201   :  { %v3081_v46 = vld [vmem:[#allocation16 + $0x98] sm:$0xff] }
 0x202   :  { %1652 = vmatpush.bf16.msrb.mxu2 %v2613_v59  ;;  %1666 = vmatpush.bf16.msrb.mxu3 %v2741_v62  ;;  %v3001_v59 = vld [vmem:[#allocation14 + $0x14] sm:$0xf0] }
 0x203   :  { %1640 = vmatpush.bf16.msrb.mxu1 %v2705_v18  ;;  %v3033_v62 = vld [vmem:[#allocation14 + $0x114] sm:$0xf0]  ;;  %1629 = vmatpush.bf16.msrb.mxu0 %v2529_v52  ;;  %v2513_v3 = vor.u32 %v3001_v59, %v2512_v58  ;;  %v3088_v52 = vld [vmem:[#allocation16 + $0xd0] sm:$0xff]  ;;  %v1239_v58 = vperm.slane %v1237_v54, 0  ;;  %v3086_v59 = vld [vmem:[#allocation16 + $0xc0] sm:$0xff] }
 0x204   :  { %v2641_v4 = vor.u32 %v3033_v62, %v2640_v60  ;;  %v3089_v50 = vld [vmem:[#allocation16 + $0xd8] sm:$0xff] }
 0x206   :  { %1653 = vmatpush.bf16.msrb.mxu2 %v2597_v7  ;;  %1667 = vmatpush.bf16.msrb.mxu3 %v2725_v10  ;;  %v1053_v7 = vld [vmem:[#allocation13] sm:$0x3] }
 0x207   :  { %1641 = vmatpush.bf16.msrb.mxu1 %v2689_v30  ;;  %1630 = vmatpush.bf16.msrb.mxu0 %v2513_v3  ;;  %v1055_v10 = vperm.slane %v1053_v7, 0  ;;  %v1056_v11 = vperm.slane %v1053_v7, 1  ;;  %v3075_v30 = vld [vmem:[#allocation16 + $0x68] sm:$0xff] }
 0x20a   :  { %1654 = vmatpush.bf16.msrb.mxu2 %v2581_v19  ;;  %1668 = vmatpush.bf16.msrb.mxu3 %v2709_v22 }
 0x20b   :  { %1642 = vmatpush.bf16.msrb.mxu1 %v2673_v40  ;;  %v3072_v40 = vld [vmem:[#allocation16 + $0x50] sm:$0xff] }
 0x20e   :  { %1655 = vmatpush.bf16.msrb.mxu2 %v2565_v31  ;;  %1669 = vmatpush.bf16.msrb.mxu3 %v2693_v35  ;;  %v3065_v31 = vld [vmem:[#allocation16 + $0x18] sm:$0xff]  ;;  %v3084_v35 = vld [vmem:[#allocation16 + $0xb0] sm:$0xff] }
 0x20f   :  { %1643 = vmatpush.bf16.msrb.mxu1 %v2657_v56 }
 0x212   :  { %1656 = vmatpush.bf16.msrb.mxu2 %v2549_v44  ;;  %1670 = vmatpush.bf16.msrb.mxu3 %v2677_v48  ;;  %v3071_v44 = vld [vmem:[#allocation16 + $0x48] sm:$0xff]  ;;  %v3090_v48 = vld [vmem:[#allocation16 + $0xe0] sm:$0xff] }
 0x213   :  { %1644 = vmatpush.bf16.msrb.mxu1 %v2641_v4 }
 0x216   :  { %1657 = vmatpush.bf16.msrb.mxu2 %v2533_v57  ;;  %1671 = vmatpush.bf16.msrb.mxu3 %v2661_v61 }
 0x21a   :  { %1658 = vmatpush.bf16.msrb.mxu2 %v2517_v5  ;;  %1672 = vmatpush.bf16.msrb.mxu3 %v2645_v6 }
 0x280   :  { %v1148_v8 = vpop.f32.mrf.mxu2  ;;  %v1162_v9 = vpop.f32.mrf.mxu3 }
 0x281   :  { %v1149_v12 = vadd.f32 %v1148_v8, %v1055_v10  ;;  %v1163_v13 = vadd.f32 %v1162_v9, %v1056_v11 }
 0x283   :  { %v1167_v18 = vmax.f32 %v1149_v12, 0.0  ;;  %v1168_v19 = vmax.f32 %v1163_v13, 0.0 }
 0x288   :  { %v1150_v14 = vpop.f32.mrf.mxu2  ;;  %v1164_v15 = vpop.f32.mrf.mxu3 }
 0x289   :  { %v1151_v16 = vadd.f32 %v1150_v14, %v1055_v10  ;;  %v1165_v17 = vadd.f32 %v1164_v15, %v1056_v11  ;;  %v1241_v15 = vperm.slane %v1237_v54, 2 }
 0x28b   :  { %v1169_v20 = vmax.f32 %v1151_v16, 0.0  ;;  %v1170_v21 = vmax.f32 %v1165_v17, 0.0 }
 0x28d   :  { %v1171_v22 = vpack.c.bf16 %v1169_v20, %v1167_v18  ;;  %v1172_v23 = vpack.c.bf16 %v1170_v21, %v1168_v19 }
 0x28f   :  { %1575 = vmatmul.bf16.vlgmr.msra.gmra.mxu0 %v1171_v22  ;;  %1589 = vmatmul.bf16.vlgmr.msra.gmra.mxu1 %v1172_v23 }
 0x290   :  { %1603 = vmatmul.bf16.vlgmr.msra.gmra.mxu2 %v1171_v22  ;;  %1617 = vmatmul.bf16.vlgmr.msra.gmra.mxu3 %v1172_v23 }
 0x291   :  { %1951 = vmatpush.bf16.msra.mxu0 %v3069_v24  ;;  %1965 = vmatpush.bf16.msra.mxu1 %v3077_v25 }
 0x292   :  { %1979 = vmatpush.bf16.msra.mxu2 %v3085_v32  ;;  %1993 = vmatpush.bf16.msra.mxu3 %v3093_v37 }
 0x295   :  { %1952 = vmatpush.bf16.msra.mxu0 %v3068_v26  ;;  %1966 = vmatpush.bf16.msra.mxu1 %v3076_v27 }
 0x296   :  { %1980 = vmatpush.bf16.msra.mxu2 %v3084_v35  ;;  %1994 = vmatpush.bf16.msra.mxu3 %v3092_v41 }
 0x299   :  { %1953 = vmatpush.bf16.msra.mxu0 %v3067_v28  ;;  %1967 = vmatpush.bf16.msra.mxu1 %v3075_v30 }
 0x29a   :  { %1981 = vmatpush.bf16.msra.mxu2 %v3083_v39  ;;  %1995 = vmatpush.bf16.msra.mxu3 %v3091_v45 }
 0x29d   :  { %1954 = vmatpush.bf16.msra.mxu0 %v3066_v29  ;;  %1968 = vmatpush.bf16.msra.mxu1 %v3074_v33 }
 0x29e   :  { %1982 = vmatpush.bf16.msra.mxu2 %v3082_v43  ;;  %1996 = vmatpush.bf16.msra.mxu3 %v3090_v48 }
 0x29f   :  { %1631 = vmatmul.bf16.vlgmr.msrb.gmra.mxu0 %v1171_v22  ;;  %1645 = vmatmul.bf16.vlgmr.msrb.gmra.mxu1 %v1172_v23 }
 0x2a0   :  { %1659 = vmatmul.bf16.vlgmr.msrb.gmra.mxu2 %v1171_v22  ;;  %1673 = vmatmul.bf16.vlgmr.msrb.gmra.mxu3 %v1172_v23  ;;  %v1242_v23 = vperm.slane %v1237_v54, 3 }
 0x2a1   :  { %1955 = vmatpush.bf16.msra.mxu0 %v3065_v31  ;;  %1969 = vmatpush.bf16.msra.mxu1 %v3073_v36 }
 0x2a2   :  { %1983 = vmatpush.bf16.msra.mxu2 %v3081_v46  ;;  %1997 = vmatpush.bf16.msra.mxu3 %v3089_v50 }
 0x2a5   :  { %1956 = vmatpush.bf16.msra.mxu0 %v3064_v34  ;;  %1970 = vmatpush.bf16.msra.mxu1 %v3072_v40 }
 0x2a6   :  { %1984 = vmatpush.bf16.msra.mxu2 %v3080_v49  ;;  %1998 = vmatpush.bf16.msra.mxu3 %v3088_v52 }
 0x2a9   :  { %1957 = vmatpush.bf16.msra.mxu0 %v3063_v38  ;;  %1971 = vmatpush.bf16.msra.mxu1 %v3071_v44 }
 0x2aa   :  { %1985 = vmatpush.bf16.msra.mxu2 %v3079_v51  ;;  %1999 = vmatpush.bf16.msra.mxu3 %v3087_v55 }
 0x2ad   :  { %1958 = vmatpush.bf16.msra.mxu0 %v3062_v42  ;;  %1972 = vmatpush.bf16.msra.mxu1 %v3070_v47  ;;  %v3112_v42 = vld [vmem:[%s3559_s12] ss:$0 sm:$0xff] }
 0x2ae   :  { %1986 = vmatpush.bf16.msra.mxu2 %v3078_v53  ;;  %2000 = vmatpush.bf16.msra.mxu3 %v3086_v59 }
 0x30c   :  { %v1576_v56 = vpop.f32.mrf.mxu0  ;;  %v1590_v57 = vpop.f32.mrf.mxu1 }
 0x30d   :  { %v1577_v60 = vadd.f32 %v1576_v56, %v1239_v58 }
 0x30f   :  { %v1591_v2 = vadd.f32 %v1590_v57, %v1577_v60 }
 0x311   :  { %v1679_v6 = vmax.f32 %v1591_v2, 0.0 }
 0x313   :  { %v1604_v61 = vpop.f32.mrf.mxu2  ;;  %v1618_v62 = vpop.f32.mrf.mxu3 }
 0x314   :  { %v1578_v0 = vpop.f32.mrf.mxu0  ;;  %v1592_v1 = vpop.f32.mrf.mxu1  ;;  %v1605_v5 = vadd.f32 %v1604_v61, %v1240_v63 }
 0x315   :  { %v1579_v3 = vadd.f32 %v1578_v0, %v1239_v58 }
 0x316   :  { %v1619_v11 = vadd.f32 %v1618_v62, %v1605_v5 }
 0x317   :  { %v1593_v4 = vadd.f32 %v1592_v1, %v1579_v3 }
 0x318   :  { %v1680_v17 = vmax.f32 %v1619_v11, 0.0 }
 0x319   :  { %v1683_v7 = vmax.f32 %v1593_v4, 0.0 }
 0x31b   :  { %v1687_v8 = vpack.c.bf16 %v1683_v7, %v1679_v6  ;;  %v1606_v9 = vpop.f32.mrf.mxu2  ;;  %v1620_v10 = vpop.f32.mrf.mxu3 }
 0x31c   :  { %v1607_v12 = vadd.f32 %v1606_v9, %v1240_v63  ;;  %v1632_v13 = vpop.f32.mrf.mxu0  ;;  %v1646_v14 = vpop.f32.mrf.mxu1 }
 0x31d   :  { %1959 = vmatmul.bf16.vlgmr.msra.gmra.mxu0 %v1687_v8  ;;  %v1633_v19 = vadd.f32 %v1632_v13, %v1241_v15 }
 0x31e   :  { %v1621_v16 = vadd.f32 %v1620_v10, %v1607_v12 }
 0x31f   :  { %v1647_v25 = vadd.f32 %v1646_v14, %v1633_v19 }
 0x320   :  { %v1684_v18 = vmax.f32 %v1621_v16, 0.0 }
 0x321   :  { %v1681_v30 = vmax.f32 %v1647_v25, 0.0 }
 0x322   :  { %v1688_v20 = vpack.c.bf16 %v1684_v18, %v1680_v17 }
 0x323   :  { %v1660_v21 = vpop.f32.mrf.mxu2  ;;  %v1674_v22 = vpop.f32.mrf.mxu3 }
 0x324   :  { %1973 = vmatmul.bf16.vlgmr.msra.gmra.mxu1 %v1688_v20  ;;  %v1634_v24 = vpop.f32.mrf.mxu0  ;;  %v1648_v27 = vpop.f32.mrf.mxu1  ;;  %v1661_v29 = vadd.f32 %v1660_v21, %v1242_v23 }
 0x325   :  { %v1635_v26 = vadd.f32 %v1634_v24, %v1241_v15 }
 0x326   :  { %v1675_v34 = vadd.f32 %v1674_v22, %v1661_v29 }
 0x327   :  { %v1649_v28 = vadd.f32 %v1648_v27, %v1635_v26 }
 0x328   :  { %v1682_v38 = vmax.f32 %v1675_v34, 0.0 }
 0x329   :  { %v1685_v31 = vmax.f32 %v1649_v28, 0.0 }
 0x32b   :  { %v1689_v32 = vpack.c.bf16 %v1685_v31, %v1681_v30  ;;  %v1662_v33 = vpop.f32.mrf.mxu2  ;;  %v1676_v36 = vpop.f32.mrf.mxu3 }
 0x32c   :  { %v1663_v35 = vadd.f32 %v1662_v33, %v1242_v23 }
 0x32d   :  { %1987 = vmatmul.bf16.vlgmr.msra.gmra.mxu2 %v1689_v32 }
 0x32e   :  { %v1677_v37 = vadd.f32 %v1676_v36, %v1663_v35 }
 0x330   :  { %v1686_v39 = vmax.f32 %v1677_v37, 0.0 }
 0x332   :  { %v1690_v40 = vpack.c.bf16 %v1686_v39, %v1682_v38 }
 0x334   :  { %2001 = vmatmul.bf16.vlgmr.msra.gmra.mxu3 %v1690_v40 }
 0x39a   :  { %v1960_v41 = vpop.f32.mrf.mxu0 }
 0x39b   :  { %v1961_v45 = vadd.f32 %v3112_v42, %v1960_v41 }
 0x3a1   :  { %v1974_v43 = vpop.f32.mrf.mxu1 }
 0x3a2   :  { %v1975_v46 = vadd.f32 %v1974_v43, %v1961_v45  ;;  %v1962_v48 = vpop.f32.mrf.mxu0 }
 0x3a3   :  { %v1963_v52 = vadd.f32 %v3112_v42, %v1962_v48 }
 0x3a9   :  { %v1976_v51 = vpop.f32.mrf.mxu1 }
 0x3aa   :  { %v1977_v54 = vadd.f32 %v1976_v51, %v1963_v52 }
 0x3b0   :  { %v1988_v44 = vpop.f32.mrf.mxu2 }
 0x3b1   :  { %v1989_v47 = vadd.f32 %v1988_v44, %v1975_v46 }
 0x3b7   :  { %v2002_v49 = vpop.f32.mrf.mxu3 }
 0x3b8   :  { %v2003_v50 = vadd.f32 %v2002_v49, %v1989_v47  ;;  %v1990_v53 = vpop.f32.mrf.mxu2 }
 0x3b9   :  { %v1991_v55 = vadd.f32 %v1990_v53, %v1977_v54 }
 0x3ba   :  { %2007 = vst [vmem:[#allocation18] sm:$0xff] %v2003_v50 }
 0x3bf   :  { %v2004_v56 = vpop.f32.mrf.mxu3 }
 0x3c0   :  { %v2005_v57 = vadd.f32 %v2004_v56, %v1991_v55 }
 0x3c2   :  { %2008 = vst [vmem:[#allocation18 + $0x8] sm:$0xff] %v2005_v57 }
 0x3c3   :  { %2034 = dma.vmem_to_hbm [thread:$0]  %s2027_s19, 256, %s2029_s16, [#allocation19], %s3395_s1, %s3395_s1, %s3396_s28  }
 0x3c4   :  { %3387 = dma.done.wait [#allocation4], 256  }
 0x3c5   :  { %3388 = vsyncadd [#allocation4], 4294967040 }
 0x3c6   :  { %3389 = dma.done.wait [#allocation19], 256  }
 0x3c7   :  { %3390 = vsyncadd [#allocation19], 4294967040 }
 0x3c8   :  { %2043 = vsyncpa [#allocation3], 1 }
 0x3c9   :  { %2044 = vsyncpa [#allocation6], 1 }
 0x3ca   :  { %2045 = vsyncpa [#allocation9], 1 }
 0x3cb   :  { %2046 = vsyncpa [#allocation12], 1 }
 0x3cc   :  { %2047 = vsyncpa [#allocation15], 1 }
 0x3cd   :  { %2048 = vsyncpa [#allocation4], 1 }
 0x3ce   :  { %2049 = vsyncpa [#allocation19], 1 }

</bundles_post_ra>
